<compile_context>
chip_gen: v6e
topology: v6e:2x2x1
jax: 0.10.0
libtpu: 0.0.40
codegen_flags: <defaults>
</compile_context>

<pallas_src>
import jax
import jax.numpy as jnp
from jax.experimental import pallas as pl
from jax.experimental.pallas import tpu as pltpu


def lstm_seq_kernel(x_ref, h0_ref, c0_ref,
                    wx_ref, b_ref, wh_ref,
                    wdec_ref, bdec_ref,
                    out_ref, hT_ref, cT_ref,
                    px_scr, hs_scr):
    B, Hp = h0_ref.shape
    T = x_ref.shape[0] // B

    # Hoisted input projection for all T*B rows in one MXU matmul.
    # The fused bias b = b_x + b_h is folded in here (off the serial path).
    px_scr[...] = (jnp.dot(x_ref[...], wx_ref[...],
                           preferred_element_type=jnp.float32) + b_ref[...])

    wh = wh_ref[...]                                     # resident (Hp, 4Hp)

    def step(t, carry):
        h, c = carry                                     # (B, Hp) each
        r = pl.multiple_of(t * B, B)                     # sublane-aligned offset
        # Recurrent projection: the only matmul on the serial path.
        g = (jnp.dot(h, wh, preferred_element_type=jnp.float32)
             + px_scr[pl.ds(r, B), :])                   # (B, 4Hp)
        # Gate order [f, i, o, z]; all slices land on 128-lane boundaries.
        s = jax.nn.sigmoid(g[:, :3 * Hp])                # one fused sigmoid (EUP)
        z = jnp.tanh(g[:, 3 * Hp:])
        c_new = s[:, 0:Hp] * c + s[:, Hp:2 * Hp] * z     # f*c + i*z
        h_new = s[:, 2 * Hp:3 * Hp] * jnp.tanh(c_new)    # o * tanh(c)
        hs_scr[pl.ds(r, B), :] = h_new                   # sublane-dense (B,Hp) store
        return (h_new, c_new)

    h_fin, c_fin = jax.lax.fori_loop(
        0, T, step, (h0_ref[...], c0_ref[...]), unroll=min(T, 8))

    # Hoisted decoder: one (T*B,Hp)@(Hp,Op) matmul, single lane-dense store.
    out_ref[...] = (jnp.dot(hs_scr[...], wdec_ref[...],
                            preferred_element_type=jnp.float32) + bdec_ref[...])
    hT_ref[...] = h_fin
    cT_ref[...] = c_fin


def _round_up(x, m):
    return (x + m - 1) // m * m


def _pad_gate_cols(w, H, Hp):
    """(in, 4H) stacked [f|i|o|z] -> (in, 4Hp): pad each gate block to Hp lanes."""
    if Hp == H:
        return w
    blocks = [w[:, g * H:(g + 1) * H] for g in range(4)]
    return jnp.concatenate(
        [jnp.pad(blk, ((0, 0), (0, Hp - H))) for blk in blocks], axis=1)


def lstm_forward(tokens, h0, c0, p, *, block_seqs=8):
    """tokens: (S, T) int32; h0, c0: (S, 1, H) float32.

    Returns (out: (S, T, O), h_T: (S, 1, H), c_T: (S, 1, H)).  Each sequence is
    processed exactly like repeated calls of the PyTorch module's forward."""
    S, T = tokens.shape
    E = p["embedding"].shape[-1]
    H = h0.shape[-1]
    O = p["W_dec"].shape[-1]

    B = min(block_seqs, S)
    assert S % B == 0, "S must be divisible by the per-block batch"
    G = S // B

    Hp = _round_up(H, 128)   # gate slices on vreg lane boundaries
    Op = _round_up(O, 128)   # lane-dense decoder output (unmasked vst)

    # Embedding lookup (gather) stays in JAX glue.
    x_emb = jnp.take(p["embedding"], tokens, axis=0)               # (S, T, E)
    # Time-major grouping: block g row t*B + j  <->  (sequence g*B + j, time t).
    x_g = (x_emb.reshape(G, B, T, E).transpose(0, 2, 1, 3)
                 .reshape(G, T * B, E))

    # Pad / restack parameters once, outside the kernel.  Padded lanes have
    # zero weights/biases, so padded h/c lanes stay exactly zero.
    wx = _pad_gate_cols(p["W_x"], H, Hp)                           # (E, 4Hp)
    wh = jnp.pad(_pad_gate_cols(p["W_h"], H, Hp),
                 ((0, Hp - H), (0, 0)))                            # (Hp, 4Hp)
    b = _pad_gate_cols(p["b_x"] + p["b_h"], H, Hp)                 # (1, 4Hp), b_h folded
    wdec = jnp.pad(p["W_dec"], ((0, Hp - H), (0, Op - O)))         # (Hp, Op)
    bdec = jnp.pad(p["b_dec"], ((0, 0), (0, Op - O)))              # (1, Op)

    h0_g = jnp.pad(h0[:, 0, :].reshape(G, B, H),
                   ((0, 0), (0, 0), (0, Hp - H)))                  # (G, B, Hp)
    c0_g = jnp.pad(c0[:, 0, :].reshape(G, B, H),
                   ((0, 0), (0, 0), (0, Hp - H)))

    flops = S * T * (2 * E * 4 * Hp + 2 * Hp * 4 * Hp + 2 * Hp * Op)
    trans = S * T * 5 * Hp
    nbytes = 4 * (x_g.size + h0_g.size + c0_g.size + wx.size + wh.size
                  + b.size + wdec.size + bdec.size
                  + G * (T * B * Op + 2 * B * Hp))

    def per_blk(shape):      # per-grid-step block (leading dim squeezed)
        return pl.BlockSpec((None,) + shape, lambda g: (g,) + (0,) * len(shape))

    def const(shape):        # grid-resident weight block
        return pl.BlockSpec(shape, lambda g: (0,) * len(shape))

    out_g, hT_g, cT_g = pl.pallas_call(
        lstm_seq_kernel,
        out_shape=(
            jax.ShapeDtypeStruct((G, T * B, Op), jnp.float32),
            jax.ShapeDtypeStruct((G, B, Hp), jnp.float32),
            jax.ShapeDtypeStruct((G, B, Hp), jnp.float32),
        ),
        grid=(G,),
        in_specs=[
            per_blk((T * B, E)),        # x        (per block of B sequences)
            per_blk((B, Hp)),           # h0
            per_blk((B, Hp)),           # c0
            const((E, 4 * Hp)),         # W_x      (resident across grid)
            const((1, 4 * Hp)),         # b_x + b_h
            const((Hp, 4 * Hp)),        # W_h
            const((Hp, Op)),            # W_dec
            const((1, Op)),             # b_dec
        ],
        out_specs=(
            per_blk((T * B, Op)),
            per_blk((B, Hp)),
            per_blk((B, Hp)),
        ),
        scratch_shapes=[
            pltpu.VMEM((T * B, 4 * Hp), jnp.float32),   # px for the whole block
            pltpu.VMEM((T * B, Hp), jnp.float32),       # hidden states for decoder
        ],
        compiler_params=pltpu.CompilerParams(
            dimension_semantics=("parallel",),
            vmem_limit_bytes=32 * 1024 * 1024),
        cost_estimate=pl.CostEstimate(
            flops=flops, transcendentals=trans, bytes_accessed=nbytes),
    )(x_g, h0_g, c0_g, wx, b, wh, wdec, bdec)

    # Undo the time-major group layout and strip padding.
    out = (out_g.reshape(G, T, B, Op).transpose(0, 2, 1, 3)
                .reshape(S, T, Op)[:, :, :O])
    hT = hT_g.reshape(S, 1, Hp)[:, :, :H]
    cT = cT_g.reshape(S, 1, Hp)[:, :, :H]
    return out, hT, cT


def reference_forward(tokens, h0, c0, p):
    """Pure-JAX mirror of the PyTorch LSTM.forward, applied step by step
    (vectorized over the independent sequences; same math per row)."""
    S, T = tokens.shape
    H = h0.shape[-1]
    h = h0[:, 0, :]
    c = c0[:, 0, :]
    outs = []
    for t in range(T):
        x = p["embedding"][tokens[:, t]]                           # encoder
        g = x @ p["W_x"] + p["b_x"] + h @ p["W_h"] + p["b_h"]      # [f|i|o|z]
        f_g = jax.nn.sigmoid(g[:, 0:H])
        i_g = jax.nn.sigmoid(g[:, H:2 * H])
        o_g = jax.nn.sigmoid(g[:, 2 * H:3 * H])
        c_tilda = jnp.tanh(g[:, 3 * H:4 * H])
        c = f_g * c + i_g * c_tilda
        h = o_g * jnp.tanh(c)
        outs.append(h @ p["W_dec"] + p["b_dec"])                   # decoder
    out = jnp.stack(outs, axis=1)                                  # (S, T, O)
    return out, h[:, None, :], c[:, None, :]


def init_params(key, input_size, hidden_size, embed_size, output_size):
    V, H, E, O = input_size, hidden_size, embed_size, output_size
    ks = jax.random.split(key, 7)
    n = lambda k, shape, scale=0.1: (scale * jax.random.normal(k, shape)).astype(jnp.float32)
    # Linear weights pre-transposed to (in, out); gate stacking order [f, i, o, z].
    return {
        "embedding": n(ks[0], (V, E), 1.0),
        "W_x": n(ks[1], (E, 4 * H)),   # [W_fx | W_ix | W_ox | W_cx]
        "b_x": n(ks[2], (1, 4 * H)),
        "W_h": n(ks[3], (H, 4 * H)),   # [W_fh | W_ih | W_oh | W_ch]
        "b_h": n(ks[4], (1, 4 * H)),
        "W_dec": n(ks[5], (H, O)),
        "b_dec": n(ks[6], (1, O)),
    }


if __name__ == "__main__":
    # input_size (vocab), hidden_size, embed_size, output_size
    V, H, E, O = 16, 32, 32, 16
    S, T = 16, 8   # independent sequences, timesteps; B=8 -> grid=(2,)

    key = jax.random.PRNGKey(0)
    kp, kt, kh, kc = jax.random.split(key, 4)
    params = init_params(kp, V, H, E, O)

    tokens = jax.random.randint(kt, (S, T), 0, V, dtype=jnp.int32)
    h0 = (0.1 * jax.random.normal(kh, (S, 1, H))).astype(jnp.float32)
    c0 = (0.1 * jax.random.normal(kc, (S, 1, H))).astype(jnp.float32)

    out, hT, cT = jax.block_until_ready(lstm_forward(tokens, h0, c0, params))

    out_ref, hT_ref, cT_ref = reference_forward(tokens, h0, c0, params)
    assert jnp.allclose(out, out_ref, atol=1e-4, rtol=1e-4), float(jnp.max(jnp.abs(out - out_ref)))
    assert jnp.allclose(hT, hT_ref, atol=1e-4, rtol=1e-4)
    assert jnp.allclose(cT, cT_ref, atol=1e-4, rtol=1e-4)

    print("KERNEL_OK")
</pallas_src>

<mosaic_0001>
module attributes {stable_mosaic.version = 11 : i64} {
  func.func @lstm_seq_kernel(%arg0: i32, %arg1: memref<1x64x32xf32, #tpu.memory_space<vmem>>, %arg2: memref<1x8x128xf32, #tpu.memory_space<vmem>>, %arg3: memref<1x8x128xf32, #tpu.memory_space<vmem>>, %arg4: memref<32x512xf32, #tpu.memory_space<vmem>>, %arg5: memref<1x512xf32, #tpu.memory_space<vmem>>, %arg6: memref<128x512xf32, #tpu.memory_space<vmem>>, %arg7: memref<128x128xf32, #tpu.memory_space<vmem>>, %arg8: memref<1x128xf32, #tpu.memory_space<vmem>>, %arg9: memref<1x64x128xf32, #tpu.memory_space<vmem>>, %arg10: memref<1x8x128xf32, #tpu.memory_space<vmem>>, %arg11: memref<1x8x128xf32, #tpu.memory_space<vmem>>, %arg12: memref<64x512xf32, #tpu.memory_space<vmem>>, %arg13: memref<64x128xf32, #tpu.memory_space<vmem>>) attributes {dimension_semantics = [#tpu.dimension_semantics<parallel>], iteration_bounds = array<i64: 2>, scalar_prefetch = 0 : i64, scratch_operands = 2 : i64, tpu.core_type = #tpu.core_type<tc>, window_params = [{transform_indices = @transform_0, window_bounds = array<i64: 1, 64, 32>}, {transform_indices = @transform_1, window_bounds = array<i64: 1, 8, 128>}, {transform_indices = @transform_2, window_bounds = array<i64: 1, 8, 128>}, {pipeline_mode = #tpu.pipeline_mode<synchronous>, transform_indices = @transform_3, window_bounds = array<i64: 32, 512>}, {pipeline_mode = #tpu.pipeline_mode<synchronous>, transform_indices = @transform_4, window_bounds = array<i64: 1, 512>}, {pipeline_mode = #tpu.pipeline_mode<synchronous>, transform_indices = @transform_5, window_bounds = array<i64: 128, 512>}, {pipeline_mode = #tpu.pipeline_mode<synchronous>, transform_indices = @transform_6, window_bounds = array<i64: 128, 128>}, {pipeline_mode = #tpu.pipeline_mode<synchronous>, transform_indices = @transform_7, window_bounds = array<i64: 1, 128>}, {transform_indices = @transform_8, window_bounds = array<i64: 1, 64, 128>}, {transform_indices = @transform_9, window_bounds = array<i64: 1, 8, 128>}, {transform_indices = @transform_10, window_bounds = array<i64: 1, 8, 128>}]} {
    %c0 = arith.constant 0 : index
    %c0_0 = arith.constant 0 : index
    %c0_1 = arith.constant 0 : index
    %0 = vector.load %arg1[%c0, %c0_0, %c0_1] : memref<1x64x32xf32, #tpu.memory_space<vmem>>, vector<1x64x32xf32>
    %1 = vector.shape_cast %0 : vector<1x64x32xf32> to vector<64x32xf32>
    %c0_2 = arith.constant 0 : index
    %c0_3 = arith.constant 0 : index
    %2 = vector.load %arg4[%c0_2, %c0_3] : memref<32x512xf32, #tpu.memory_space<vmem>>, vector<32x512xf32>
    %cst = arith.constant dense<0.000000e+00> : vector<64x512xf32>
    %3 = tpu.matmul %1, %2, %cst {dimension_numbers = #tpu.dot_dimension_numbers<[1], [0], [0], [1], [0, 0, 1, 1], [], []>} : vector<64x32xf32>, vector<32x512xf32>, vector<64x512xf32> -> vector<64x512xf32>
    %c0_4 = arith.constant 0 : index
    %c0_5 = arith.constant 0 : index
    %4 = vector.load %arg5[%c0_4, %c0_5] : memref<1x512xf32, #tpu.memory_space<vmem>>, vector<1x512xf32>
    %5 = vector.broadcast %4 : vector<1x512xf32> to vector<64x512xf32>
    %6 = arith.addf %3, %5 : vector<64x512xf32>
    %c0_6 = arith.constant 0 : index
    %c0_7 = arith.constant 0 : index
    %7 = vector.load %arg12[%c0_6, %c0_7] : memref<64x512xf32, #tpu.memory_space<vmem>>, vector<64x512xf32>
    tpu.vector_store %arg12[%c0_6, %c0_7], %6 {strides = array<i32>} : memref<64x512xf32, #tpu.memory_space<vmem>>, vector<64x512xf32>,
    %c0_8 = arith.constant 0 : index
    %c0_9 = arith.constant 0 : index
    %8 = vector.load %arg6[%c0_8, %c0_9] : memref<128x512xf32, #tpu.memory_space<vmem>>, vector<128x512xf32>
    %c0_10 = arith.constant 0 : index
    %c0_11 = arith.constant 0 : index
    %c0_12 = arith.constant 0 : index
    %9 = vector.load %arg2[%c0_10, %c0_11, %c0_12] : memref<1x8x128xf32, #tpu.memory_space<vmem>>, vector<1x8x128xf32>
    %10 = vector.shape_cast %9 : vector<1x8x128xf32> to vector<8x128xf32>
    %c0_13 = arith.constant 0 : index
    %c0_14 = arith.constant 0 : index
    %c0_15 = arith.constant 0 : index
    %11 = vector.load %arg3[%c0_13, %c0_14, %c0_15] : memref<1x8x128xf32, #tpu.memory_space<vmem>>, vector<1x8x128xf32>
    %12 = vector.shape_cast %11 : vector<1x8x128xf32> to vector<8x128xf32>
    %c0_i32 = arith.constant 0 : i32
    %c8_i32 = arith.constant 8 : i32
    %13 = arith.muli %c0_i32, %c8_i32 : i32
    %14 = tpu.assume_multiple %13, 8 : i32
    %cst_16 = arith.constant dense<0.000000e+00> : vector<8x512xf32>
    %15 = tpu.matmul %10, %8, %cst_16 {dimension_numbers = #tpu.dot_dimension_numbers<[1], [0], [0], [1], [0, 0, 1, 1], [], []>} : vector<8x128xf32>, vector<128x512xf32>, vector<8x512xf32> -> vector<8x512xf32>
    %16 = arith.index_cast %14 : i32 to index
    %c0_17 = arith.constant 0 : index
    %17 = vector.load %arg12[%16, %c0_17] : memref<64x512xf32, #tpu.memory_space<vmem>>, vector<8x512xf32>
    %18 = arith.addf %15, %17 : vector<8x512xf32>
    %19 = vector.extract_strided_slice %18 {offsets = [0, 0], sizes = [8, 384], strides = [1, 1]} : vector<8x512xf32> to vector<8x384xf32>
    %20 = arith.negf %19 : vector<8x384xf32>
    %21 = math.exp %20 : vector<8x384xf32>
    %cst_18 = arith.constant 1.000000e+00 : f32
    %22 = vector.broadcast %cst_18 : f32 to vector<8x384xf32>
    %23 = arith.addf %22, %21 : vector<8x384xf32>
    %24 = arith.divf %22, %23 : vector<8x384xf32>
    %25 = vector.extract_strided_slice %18 {offsets = [0, 384], sizes = [8, 128], strides = [1, 1]} : vector<8x512xf32> to vector<8x128xf32>
    %26 = math.tanh %25 : vector<8x128xf32>
    %27 = vector.extract_strided_slice %24 {offsets = [0, 0], sizes = [8, 128], strides = [1, 1]} : vector<8x384xf32> to vector<8x128xf32>
    %28 = arith.mulf %27, %12 : vector<8x128xf32>
    %29 = vector.extract_strided_slice %24 {offsets = [0, 128], sizes = [8, 128], strides = [1, 1]} : vector<8x384xf32> to vector<8x128xf32>
    %30 = arith.mulf %29, %26 : vector<8x128xf32>
    %31 = arith.addf %28, %30 : vector<8x128xf32>
    %32 = vector.extract_strided_slice %24 {offsets = [0, 256], sizes = [8, 128], strides = [1, 1]} : vector<8x384xf32> to vector<8x128xf32>
    %33 = math.tanh %31 : vector<8x128xf32>
    %34 = arith.mulf %32, %33 : vector<8x128xf32>
    %35 = arith.index_cast %14 : i32 to index
    %c0_19 = arith.constant 0 : index
    %36 = vector.load %arg13[%35, %c0_19] : memref<64x128xf32, #tpu.memory_space<vmem>>, vector<8x128xf32>
    tpu.vector_store %arg13[%35, %c0_19], %34 {strides = array<i32>} : memref<64x128xf32, #tpu.memory_space<vmem>>, vector<8x128xf32>,
    %c1_i32 = arith.constant 1 : i32
    %c8_i32_20 = arith.constant 8 : i32
    %37 = arith.muli %c1_i32, %c8_i32_20 : i32
    %38 = tpu.assume_multiple %37, 8 : i32
    %cst_21 = arith.constant dense<0.000000e+00> : vector<8x512xf32>
    %39 = tpu.matmul %34, %8, %cst_21 {dimension_numbers = #tpu.dot_dimension_numbers<[1], [0], [0], [1], [0, 0, 1, 1], [], []>} : vector<8x128xf32>, vector<128x512xf32>, vector<8x512xf32> -> vector<8x512xf32>
    %40 = arith.index_cast %38 : i32 to index
    %c0_22 = arith.constant 0 : index
    %41 = vector.load %arg12[%40, %c0_22] : memref<64x512xf32, #tpu.memory_space<vmem>>, vector<8x512xf32>
    %42 = arith.addf %39, %41 : vector<8x512xf32>
    %43 = vector.extract_strided_slice %42 {offsets = [0, 0], sizes = [8, 384], strides = [1, 1]} : vector<8x512xf32> to vector<8x384xf32>
    %44 = arith.negf %43 : vector<8x384xf32>
    %45 = math.exp %44 : vector<8x384xf32>
    %cst_23 = arith.constant 1.000000e+00 : f32
    %46 = vector.broadcast %cst_23 : f32 to vector<8x384xf32>
    %47 = arith.addf %46, %45 : vector<8x384xf32>
    %48 = arith.divf %46, %47 : vector<8x384xf32>
    %49 = vector.extract_strided_slice %42 {offsets = [0, 384], sizes = [8, 128], strides = [1, 1]} : vector<8x512xf32> to vector<8x128xf32>
    %50 = math.tanh %49 : vector<8x128xf32>
    %51 = vector.extract_strided_slice %48 {offsets = [0, 0], sizes = [8, 128], strides = [1, 1]} : vector<8x384xf32> to vector<8x128xf32>
    %52 = arith.mulf %51, %31 : vector<8x128xf32>
    %53 = vector.extract_strided_slice %48 {offsets = [0, 128], sizes = [8, 128], strides = [1, 1]} : vector<8x384xf32> to vector<8x128xf32>
    %54 = arith.mulf %53, %50 : vector<8x128xf32>
    %55 = arith.addf %52, %54 : vector<8x128xf32>
    %56 = vector.extract_strided_slice %48 {offsets = [0, 256], sizes = [8, 128], strides = [1, 1]} : vector<8x384xf32> to vector<8x128xf32>
    %57 = math.tanh %55 : vector<8x128xf32>
    %58 = arith.mulf %56, %57 : vector<8x128xf32>
    %59 = arith.index_cast %38 : i32 to index
    %c0_24 = arith.constant 0 : index
    %60 = vector.load %arg13[%59, %c0_24] : memref<64x128xf32, #tpu.memory_space<vmem>>, vector<8x128xf32>
    tpu.vector_store %arg13[%59, %c0_24], %58 {strides = array<i32>} : memref<64x128xf32, #tpu.memory_space<vmem>>, vector<8x128xf32>,
    %c2_i32 = arith.constant 2 : i32
    %c8_i32_25 = arith.constant 8 : i32
    %61 = arith.muli %c2_i32, %c8_i32_25 : i32
    %62 = tpu.assume_multiple %61, 8 : i32
    %cst_26 = arith.constant dense<0.000000e+00> : vector<8x512xf32>
    %63 = tpu.matmul %58, %8, %cst_26 {dimension_numbers = #tpu.dot_dimension_numbers<[1], [0], [0], [1], [0, 0, 1, 1], [], []>} : vector<8x128xf32>, vector<128x512xf32>, vector<8x512xf32> -> vector<8x512xf32>
    %64 = arith.index_cast %62 : i32 to index
    %c0_27 = arith.constant 0 : index
    %65 = vector.load %arg12[%64, %c0_27] : memref<64x512xf32, #tpu.memory_space<vmem>>, vector<8x512xf32>
    %66 = arith.addf %63, %65 : vector<8x512xf32>
    %67 = vector.extract_strided_slice %66 {offsets = [0, 0], sizes = [8, 384], strides = [1, 1]} : vector<8x512xf32> to vector<8x384xf32>
    %68 = arith.negf %67 : vector<8x384xf32>
    %69 = math.exp %68 : vector<8x384xf32>
    %cst_28 = arith.constant 1.000000e+00 : f32
    %70 = vector.broadcast %cst_28 : f32 to vector<8x384xf32>
    %71 = arith.addf %70, %69 : vector<8x384xf32>
    %72 = arith.divf %70, %71 : vector<8x384xf32>
    %73 = vector.extract_strided_slice %66 {offsets = [0, 384], sizes = [8, 128], strides = [1, 1]} : vector<8x512xf32> to vector<8x128xf32>
    %74 = math.tanh %73 : vector<8x128xf32>
    %75 = vector.extract_strided_slice %72 {offsets = [0, 0], sizes = [8, 128], strides = [1, 1]} : vector<8x384xf32> to vector<8x128xf32>
    %76 = arith.mulf %75, %55 : vector<8x128xf32>
    %77 = vector.extract_strided_slice %72 {offsets = [0, 128], sizes = [8, 128], strides = [1, 1]} : vector<8x384xf32> to vector<8x128xf32>
    %78 = arith.mulf %77, %74 : vector<8x128xf32>
    %79 = arith.addf %76, %78 : vector<8x128xf32>
    %80 = vector.extract_strided_slice %72 {offsets = [0, 256], sizes = [8, 128], strides = [1, 1]} : vector<8x384xf32> to vector<8x128xf32>
    %81 = math.tanh %79 : vector<8x128xf32>
    %82 = arith.mulf %80, %81 : vector<8x128xf32>
    %83 = arith.index_cast %62 : i32 to index
    %c0_29 = arith.constant 0 : index
    %84 = vector.load %arg13[%83, %c0_29] : memref<64x128xf32, #tpu.memory_space<vmem>>, vector<8x128xf32>
    tpu.vector_store %arg13[%83, %c0_29], %82 {strides = array<i32>} : memref<64x128xf32, #tpu.memory_space<vmem>>, vector<8x128xf32>,
    %c3_i32 = arith.constant 3 : i32
    %c8_i32_30 = arith.constant 8 : i32
    %85 = arith.muli %c3_i32, %c8_i32_30 : i32
    %86 = tpu.assume_multiple %85, 8 : i32
    %cst_31 = arith.constant dense<0.000000e+00> : vector<8x512xf32>
    %87 = tpu.matmul %82, %8, %cst_31 {dimension_numbers = #tpu.dot_dimension_numbers<[1], [0], [0], [1], [0, 0, 1, 1], [], []>} : vector<8x128xf32>, vector<128x512xf32>, vector<8x512xf32> -> vector<8x512xf32>
    %88 = arith.index_cast %86 : i32 to index
    %c0_32 = arith.constant 0 : index
    %89 = vector.load %arg12[%88, %c0_32] : memref<64x512xf32, #tpu.memory_space<vmem>>, vector<8x512xf32>
    %90 = arith.addf %87, %89 : vector<8x512xf32>
    %91 = vector.extract_strided_slice %90 {offsets = [0, 0], sizes = [8, 384], strides = [1, 1]} : vector<8x512xf32> to vector<8x384xf32>
    %92 = arith.negf %91 : vector<8x384xf32>
    %93 = math.exp %92 : vector<8x384xf32>
    %cst_33 = arith.constant 1.000000e+00 : f32
    %94 = vector.broadcast %cst_33 : f32 to vector<8x384xf32>
    %95 = arith.addf %94, %93 : vector<8x384xf32>
    %96 = arith.divf %94, %95 : vector<8x384xf32>
    %97 = vector.extract_strided_slice %90 {offsets = [0, 384], sizes = [8, 128], strides = [1, 1]} : vector<8x512xf32> to vector<8x128xf32>
    %98 = math.tanh %97 : vector<8x128xf32>
    %99 = vector.extract_strided_slice %96 {offsets = [0, 0], sizes = [8, 128], strides = [1, 1]} : vector<8x384xf32> to vector<8x128xf32>
    %100 = arith.mulf %99, %79 : vector<8x128xf32>
    %101 = vector.extract_strided_slice %96 {offsets = [0, 128], sizes = [8, 128], strides = [1, 1]} : vector<8x384xf32> to vector<8x128xf32>
    %102 = arith.mulf %101, %98 : vector<8x128xf32>
    %103 = arith.addf %100, %102 : vector<8x128xf32>
    %104 = vector.extract_strided_slice %96 {offsets = [0, 256], sizes = [8, 128], strides = [1, 1]} : vector<8x384xf32> to vector<8x128xf32>
    %105 = math.tanh %103 : vector<8x128xf32>
    %106 = arith.mulf %104, %105 : vector<8x128xf32>
    %107 = arith.index_cast %86 : i32 to index
    %c0_34 = arith.constant 0 : index
    %108 = vector.load %arg13[%107, %c0_34] : memref<64x128xf32, #tpu.memory_space<vmem>>, vector<8x128xf32>
    tpu.vector_store %arg13[%107, %c0_34], %106 {strides = array<i32>} : memref<64x128xf32, #tpu.memory_space<vmem>>, vector<8x128xf32>,
    %c4_i32 = arith.constant 4 : i32
    %c8_i32_35 = arith.constant 8 : i32
    %109 = arith.muli %c4_i32, %c8_i32_35 : i32
    %110 = tpu.assume_multiple %109, 8 : i32
    %cst_36 = arith.constant dense<0.000000e+00> : vector<8x512xf32>
    %111 = tpu.matmul %106, %8, %cst_36 {dimension_numbers = #tpu.dot_dimension_numbers<[1], [0], [0], [1], [0, 0, 1, 1], [], []>} : vector<8x128xf32>, vector<128x512xf32>, vector<8x512xf32> -> vector<8x512xf32>
    %112 = arith.index_cast %110 : i32 to index
    %c0_37 = arith.constant 0 : index
    %113 = vector.load %arg12[%112, %c0_37] : memref<64x512xf32, #tpu.memory_space<vmem>>, vector<8x512xf32>
    %114 = arith.addf %111, %113 : vector<8x512xf32>
    %115 = vector.extract_strided_slice %114 {offsets = [0, 0], sizes = [8, 384], strides = [1, 1]} : vector<8x512xf32> to vector<8x384xf32>
    %116 = arith.negf %115 : vector<8x384xf32>
    %117 = math.exp %116 : vector<8x384xf32>
    %cst_38 = arith.constant 1.000000e+00 : f32
    %118 = vector.broadcast %cst_38 : f32 to vector<8x384xf32>
    %119 = arith.addf %118, %117 : vector<8x384xf32>
    %120 = arith.divf %118, %119 : vector<8x384xf32>
    %121 = vector.extract_strided_slice %114 {offsets = [0, 384], sizes = [8, 128], strides = [1, 1]} : vector<8x512xf32> to vector<8x128xf32>
    %122 = math.tanh %121 : vector<8x128xf32>
    %123 = vector.extract_strided_slice %120 {offsets = [0, 0], sizes = [8, 128], strides = [1, 1]} : vector<8x384xf32> to vector<8x128xf32>
    %124 = arith.mulf %123, %103 : vector<8x128xf32>
    %125 = vector.extract_strided_slice %120 {offsets = [0, 128], sizes = [8, 128], strides = [1, 1]} : vector<8x384xf32> to vector<8x128xf32>
    %126 = arith.mulf %125, %122 : vector<8x128xf32>
    %127 = arith.addf %124, %126 : vector<8x128xf32>
    %128 = vector.extract_strided_slice %120 {offsets = [0, 256], sizes = [8, 128], strides = [1, 1]} : vector<8x384xf32> to vector<8x128xf32>
    %129 = math.tanh %127 : vector<8x128xf32>
    %130 = arith.mulf %128, %129 : vector<8x128xf32>
    %131 = arith.index_cast %110 : i32 to index
    %c0_39 = arith.constant 0 : index
    %132 = vector.load %arg13[%131, %c0_39] : memref<64x128xf32, #tpu.memory_space<vmem>>, vector<8x128xf32>
    tpu.vector_store %arg13[%131, %c0_39], %130 {strides = array<i32>} : memref<64x128xf32, #tpu.memory_space<vmem>>, vector<8x128xf32>,
    %c5_i32 = arith.constant 5 : i32
    %c8_i32_40 = arith.constant 8 : i32
    %133 = arith.muli %c5_i32, %c8_i32_40 : i32
    %134 = tpu.assume_multiple %133, 8 : i32
    %cst_41 = arith.constant dense<0.000000e+00> : vector<8x512xf32>
    %135 = tpu.matmul %130, %8, %cst_41 {dimension_numbers = #tpu.dot_dimension_numbers<[1], [0], [0], [1], [0, 0, 1, 1], [], []>} : vector<8x128xf32>, vector<128x512xf32>, vector<8x512xf32> -> vector<8x512xf32>
    %136 = arith.index_cast %134 : i32 to index
    %c0_42 = arith.constant 0 : index
    %137 = vector.load %arg12[%136, %c0_42] : memref<64x512xf32, #tpu.memory_space<vmem>>, vector<8x512xf32>
    %138 = arith.addf %135, %137 : vector<8x512xf32>
    %139 = vector.extract_strided_slice %138 {offsets = [0, 0], sizes = [8, 384], strides = [1, 1]} : vector<8x512xf32> to vector<8x384xf32>
    %140 = arith.negf %139 : vector<8x384xf32>
    %141 = math.exp %140 : vector<8x384xf32>
    %cst_43 = arith.constant 1.000000e+00 : f32
    %142 = vector.broadcast %cst_43 : f32 to vector<8x384xf32>
    %143 = arith.addf %142, %141 : vector<8x384xf32>
    %144 = arith.divf %142, %143 : vector<8x384xf32>
    %145 = vector.extract_strided_slice %138 {offsets = [0, 384], sizes = [8, 128], strides = [1, 1]} : vector<8x512xf32> to vector<8x128xf32>
    %146 = math.tanh %145 : vector<8x128xf32>
    %147 = vector.extract_strided_slice %144 {offsets = [0, 0], sizes = [8, 128], strides = [1, 1]} : vector<8x384xf32> to vector<8x128xf32>
    %148 = arith.mulf %147, %127 : vector<8x128xf32>
    %149 = vector.extract_strided_slice %144 {offsets = [0, 128], sizes = [8, 128], strides = [1, 1]} : vector<8x384xf32> to vector<8x128xf32>
    %150 = arith.mulf %149, %146 : vector<8x128xf32>
    %151 = arith.addf %148, %150 : vector<8x128xf32>
    %152 = vector.extract_strided_slice %144 {offsets = [0, 256], sizes = [8, 128], strides = [1, 1]} : vector<8x384xf32> to vector<8x128xf32>
    %153 = math.tanh %151 : vector<8x128xf32>
    %154 = arith.mulf %152, %153 : vector<8x128xf32>
    %155 = arith.index_cast %134 : i32 to index
    %c0_44 = arith.constant 0 : index
    %156 = vector.load %arg13[%155, %c0_44] : memref<64x128xf32, #tpu.memory_space<vmem>>, vector<8x128xf32>
    tpu.vector_store %arg13[%155, %c0_44], %154 {strides = array<i32>} : memref<64x128xf32, #tpu.memory_space<vmem>>, vector<8x128xf32>,
    %c6_i32 = arith.constant 6 : i32
    %c8_i32_45 = arith.constant 8 : i32
    %157 = arith.muli %c6_i32, %c8_i32_45 : i32
    %158 = tpu.assume_multiple %157, 8 : i32
    %cst_46 = arith.constant dense<0.000000e+00> : vector<8x512xf32>
    %159 = tpu.matmul %154, %8, %cst_46 {dimension_numbers = #tpu.dot_dimension_numbers<[1], [0], [0], [1], [0, 0, 1, 1], [], []>} : vector<8x128xf32>, vector<128x512xf32>, vector<8x512xf32> -> vector<8x512xf32>
    %160 = arith.index_cast %158 : i32 to index
    %c0_47 = arith.constant 0 : index
    %161 = vector.load %arg12[%160, %c0_47] : memref<64x512xf32, #tpu.memory_space<vmem>>, vector<8x512xf32>
    %162 = arith.addf %159, %161 : vector<8x512xf32>
    %163 = vector.extract_strided_slice %162 {offsets = [0, 0], sizes = [8, 384], strides = [1, 1]} : vector<8x512xf32> to vector<8x384xf32>
    %164 = arith.negf %163 : vector<8x384xf32>
    %165 = math.exp %164 : vector<8x384xf32>
    %cst_48 = arith.constant 1.000000e+00 : f32
    %166 = vector.broadcast %cst_48 : f32 to vector<8x384xf32>
    %167 = arith.addf %166, %165 : vector<8x384xf32>
    %168 = arith.divf %166, %167 : vector<8x384xf32>
    %169 = vector.extract_strided_slice %162 {offsets = [0, 384], sizes = [8, 128], strides = [1, 1]} : vector<8x512xf32> to vector<8x128xf32>
    %170 = math.tanh %169 : vector<8x128xf32>
    %171 = vector.extract_strided_slice %168 {offsets = [0, 0], sizes = [8, 128], strides = [1, 1]} : vector<8x384xf32> to vector<8x128xf32>
    %172 = arith.mulf %171, %151 : vector<8x128xf32>
    %173 = vector.extract_strided_slice %168 {offsets = [0, 128], sizes = [8, 128], strides = [1, 1]} : vector<8x384xf32> to vector<8x128xf32>
    %174 = arith.mulf %173, %170 : vector<8x128xf32>
    %175 = arith.addf %172, %174 : vector<8x128xf32>
    %176 = vector.extract_strided_slice %168 {offsets = [0, 256], sizes = [8, 128], strides = [1, 1]} : vector<8x384xf32> to vector<8x128xf32>
    %177 = math.tanh %175 : vector<8x128xf32>
    %178 = arith.mulf %176, %177 : vector<8x128xf32>
    %179 = arith.index_cast %158 : i32 to index
    %c0_49 = arith.constant 0 : index
    %180 = vector.load %arg13[%179, %c0_49] : memref<64x128xf32, #tpu.memory_space<vmem>>, vector<8x128xf32>
    tpu.vector_store %arg13[%179, %c0_49], %178 {strides = array<i32>} : memref<64x128xf32, #tpu.memory_space<vmem>>, vector<8x128xf32>,
    %c7_i32 = arith.constant 7 : i32
    %c8_i32_50 = arith.constant 8 : i32
    %181 = arith.muli %c7_i32, %c8_i32_50 : i32
    %182 = tpu.assume_multiple %181, 8 : i32
    %cst_51 = arith.constant dense<0.000000e+00> : vector<8x512xf32>
    %183 = tpu.matmul %178, %8, %cst_51 {dimension_numbers = #tpu.dot_dimension_numbers<[1], [0], [0], [1], [0, 0, 1, 1], [], []>} : vector<8x128xf32>, vector<128x512xf32>, vector<8x512xf32> -> vector<8x512xf32>
    %184 = arith.index_cast %182 : i32 to index
    %c0_52 = arith.constant 0 : index
    %185 = vector.load %arg12[%184, %c0_52] : memref<64x512xf32, #tpu.memory_space<vmem>>, vector<8x512xf32>
    %186 = arith.addf %183, %185 : vector<8x512xf32>
    %187 = vector.extract_strided_slice %186 {offsets = [0, 0], sizes = [8, 384], strides = [1, 1]} : vector<8x512xf32> to vector<8x384xf32>
    %188 = arith.negf %187 : vector<8x384xf32>
    %189 = math.exp %188 : vector<8x384xf32>
    %cst_53 = arith.constant 1.000000e+00 : f32
    %190 = vector.broadcast %cst_53 : f32 to vector<8x384xf32>
    %191 = arith.addf %190, %189 : vector<8x384xf32>
    %192 = arith.divf %190, %191 : vector<8x384xf32>
    %193 = vector.extract_strided_slice %186 {offsets = [0, 384], sizes = [8, 128], strides = [1, 1]} : vector<8x512xf32> to vector<8x128xf32>
    %194 = math.tanh %193 : vector<8x128xf32>
    %195 = vector.extract_strided_slice %192 {offsets = [0, 0], sizes = [8, 128], strides = [1, 1]} : vector<8x384xf32> to vector<8x128xf32>
    %196 = arith.mulf %195, %175 : vector<8x128xf32>
    %197 = vector.extract_strided_slice %192 {offsets = [0, 128], sizes = [8, 128], strides = [1, 1]} : vector<8x384xf32> to vector<8x128xf32>
    %198 = arith.mulf %197, %194 : vector<8x128xf32>
    %199 = arith.addf %196, %198 : vector<8x128xf32>
    %200 = vector.extract_strided_slice %192 {offsets = [0, 256], sizes = [8, 128], strides = [1, 1]} : vector<8x384xf32> to vector<8x128xf32>
    %201 = math.tanh %199 : vector<8x128xf32>
    %202 = arith.mulf %200, %201 : vector<8x128xf32>
    %203 = arith.index_cast %182 : i32 to index
    %c0_54 = arith.constant 0 : index
    %204 = vector.load %arg13[%203, %c0_54] : memref<64x128xf32, #tpu.memory_space<vmem>>, vector<8x128xf32>
    tpu.vector_store %arg13[%203, %c0_54], %202 {strides = array<i32>} : memref<64x128xf32, #tpu.memory_space<vmem>>, vector<8x128xf32>,
    %c8_i32_55 = arith.constant 8 : i32
    %c0_56 = arith.constant 0 : index
    %c0_57 = arith.constant 0 : index
    %205 = vector.load %arg13[%c0_56, %c0_57] : memref<64x128xf32, #tpu.memory_space<vmem>>, vector<64x128xf32>
    %c0_58 = arith.constant 0 : index
    %c0_59 = arith.constant 0 : index
    %206 = vector.load %arg7[%c0_58, %c0_59] : memref<128x128xf32, #tpu.memory_space<vmem>>, vector<128x128xf32>
    %cst_60 = arith.constant dense<0.000000e+00> : vector<64x128xf32>
    %207 = tpu.matmul %205, %206, %cst_60 {dimension_numbers = #tpu.dot_dimension_numbers<[1], [0], [0], [1], [0, 0, 1, 1], [], []>} : vector<64x128xf32>, vector<128x128xf32>, vector<64x128xf32> -> vector<64x128xf32>
    %c0_61 = arith.constant 0 : index
    %c0_62 = arith.constant 0 : index
    %208 = vector.load %arg8[%c0_61, %c0_62] : memref<1x128xf32, #tpu.memory_space<vmem>>, vector<1x128xf32>
    %209 = vector.broadcast %208 : vector<1x128xf32> to vector<64x128xf32>
    %210 = arith.addf %207, %209 : vector<64x128xf32>
    %c0_63 = arith.constant 0 : index
    %c0_64 = arith.constant 0 : index
    %c0_65 = arith.constant 0 : index
    %211 = vector.load %arg9[%c0_63, %c0_64, %c0_65] : memref<1x64x128xf32, #tpu.memory_space<vmem>>, vector<1x64x128xf32>
    %212 = vector.shape_cast %211 : vector<1x64x128xf32> to vector<64x128xf32>
    %213 = vector.shape_cast %210 : vector<64x128xf32> to vector<1x64x128xf32>
    tpu.vector_store %arg9[%c0_63, %c0_64, %c0_65], %213 {strides = array<i32>} : memref<1x64x128xf32, #tpu.memory_space<vmem>>, vector<1x64x128xf32>,
    %c0_66 = arith.constant 0 : index
    %c0_67 = arith.constant 0 : index
    %c0_68 = arith.constant 0 : index
    %214 = vector.load %arg10[%c0_66, %c0_67, %c0_68] : memref<1x8x128xf32, #tpu.memory_space<vmem>>, vector<1x8x128xf32>
    %215 = vector.shape_cast %214 : vector<1x8x128xf32> to vector<8x128xf32>
    %216 = vector.shape_cast %202 : vector<8x128xf32> to vector<1x8x128xf32>
    tpu.vector_store %arg10[%c0_66, %c0_67, %c0_68], %216 {strides = array<i32>} : memref<1x8x128xf32, #tpu.memory_space<vmem>>, vector<1x8x128xf32>,
    %c0_69 = arith.constant 0 : index
    %c0_70 = arith.constant 0 : index
    %c0_71 = arith.constant 0 : index
    %217 = vector.load %arg11[%c0_69, %c0_70, %c0_71] : memref<1x8x128xf32, #tpu.memory_space<vmem>>, vector<1x8x128xf32>
    %218 = vector.shape_cast %217 : vector<1x8x128xf32> to vector<8x128xf32>
    %219 = vector.shape_cast %199 : vector<8x128xf32> to vector<1x8x128xf32>
    tpu.vector_store %arg11[%c0_69, %c0_70, %c0_71], %219 {strides = array<i32>} : memref<1x8x128xf32, #tpu.memory_space<vmem>>, vector<1x8x128xf32>,
    return
  }
  func.func @transform_0(%arg0: i32) -> (i32, i32, i32) {
    %c0_i32 = arith.constant 0 : i32
    %c0_i32_0 = arith.constant 0 : i32
    %c0_i32_1 = arith.constant 0 : i32
    return %arg0, %c0_i32, %c0_i32_0 : i32, i32, i32
  }
  func.func @transform_1(%arg0: i32) -> (i32, i32, i32) {
    %c0_i32 = arith.constant 0 : i32
    %c0_i32_0 = arith.constant 0 : i32
    %c0_i32_1 = arith.constant 0 : i32
    return %arg0, %c0_i32, %c0_i32_0 : i32, i32, i32
  }
  func.func @transform_2(%arg0: i32) -> (i32, i32, i32) {
    %c0_i32 = arith.constant 0 : i32
    %c0_i32_0 = arith.constant 0 : i32
    %c0_i32_1 = arith.constant 0 : i32
    return %arg0, %c0_i32, %c0_i32_0 : i32, i32, i32
  }
  func.func @transform_3(%arg0: i32) -> (i32, i32) {
    %c0_i32 = arith.constant 0 : i32
    %c0_i32_0 = arith.constant 0 : i32
    %c0_i32_1 = arith.constant 0 : i32
    return %c0_i32, %c0_i32_0 : i32, i32
  }
  func.func @transform_4(%arg0: i32) -> (i32, i32) {
    %c0_i32 = arith.constant 0 : i32
    %c0_i32_0 = arith.constant 0 : i32
    %c0_i32_1 = arith.constant 0 : i32
    return %c0_i32, %c0_i32_0 : i32, i32
  }
  func.func @transform_5(%arg0: i32) -> (i32, i32) {
    %c0_i32 = arith.constant 0 : i32
    %c0_i32_0 = arith.constant 0 : i32
    %c0_i32_1 = arith.constant 0 : i32
    return %c0_i32, %c0_i32_0 : i32, i32
  }
  func.func @transform_6(%arg0: i32) -> (i32, i32) {
    %c0_i32 = arith.constant 0 : i32
    %c0_i32_0 = arith.constant 0 : i32
    %c0_i32_1 = arith.constant 0 : i32
    return %c0_i32, %c0_i32_0 : i32, i32
  }
  func.func @transform_7(%arg0: i32) -> (i32, i32) {
    %c0_i32 = arith.constant 0 : i32
    %c0_i32_0 = arith.constant 0 : i32
    %c0_i32_1 = arith.constant 0 : i32
    return %c0_i32, %c0_i32_0 : i32, i32
  }
  func.func @transform_8(%arg0: i32) -> (i32, i32, i32) {
    %c0_i32 = arith.constant 0 : i32
    %c0_i32_0 = arith.constant 0 : i32
    %c0_i32_1 = arith.constant 0 : i32
    return %arg0, %c0_i32, %c0_i32_0 : i32, i32, i32
  }
  func.func @transform_9(%arg0: i32) -> (i32, i32, i32) {
    %c0_i32 = arith.constant 0 : i32
    %c0_i32_0 = arith.constant 0 : i32
    %c0_i32_1 = arith.constant 0 : i32
    return %arg0, %c0_i32, %c0_i32_0 : i32, i32, i32
  }
  func.func @transform_10(%arg0: i32) -> (i32, i32, i32) {
    %c0_i32 = arith.constant 0 : i32
    %c0_i32_0 = arith.constant 0 : i32
    %c0_i32_1 = arith.constant 0 : i32
    return %arg0, %c0_i32, %c0_i32_0 : i32, i32, i32
  }
}

</mosaic_0001>

<bundles_post_ra>
// kernel: tpu_custom_call.1
= control target key start
LH: loop header
LB: loop body
LE: loop exit
PB: predicated region body
PF: predicated region fallthrough
CT: control target
= control target key end

     0   :  { %s4589_s0 = inlined_call_operand.vmem [shape: f32[2,64,32], index: 0, kind: input, shape index: {}]   ;;  %s4590_s1 = inlined_call_operand.vmem [shape: f32[2,8,128], index: 1, kind: input, shape index: {}]   ;;  %s4591_s2 = inlined_call_operand.vmem [shape: f32[2,8,128], index: 2, kind: input, shape index: {}]   ;;  %s4592_s3 = inlined_call_operand.vmem [shape: f32[32,512], index: 3, kind: input, shape index: {}]   ;;  %s4593_s4 = inlined_call_operand.vmem [shape: f32[1,512], index: 4, kind: input, shape index: {}]   ;;  %s4594_s5 = inlined_call_operand.hbm [shape: f32[128,512], index: 5, kind: input, shape index: {}]   ;;  %s4595_s6 = inlined_call_operand.hbm [shape: f32[128,128], index: 6, kind: input, shape index: {}]   ;;  %s4596_s7 = inlined_call_operand.vmem [shape: f32[1,128], index: 7, kind: input, shape index: {}]   ;;  %s4597_s8 = inlined_call_operand.hbm [shape: f32[2,64,128], index: 8, kind: output, shape index: {0}]   ;;  %s4598_s9 = inlined_call_operand.hbm [shape: f32[2,8,128], index: 9, kind: output, shape index: {1}]   ;;  %s4599_s10 = inlined_call_operand.hbm [shape: f32[2,8,128], index: 10, kind: output, shape index: {2}]  }
   0x1   :  { %4700 = sst [smem:[#allocation73_spill]] %s4589_s0 }
   0x2   :  { %4701 = sst [smem:[#allocation74_spill]] %s4590_s1 }
   0x3   :  { %4702 = sst [smem:[#allocation75_spill]] %s4591_s2 }
   0x4   :  { %16 = vsyncpa [#allocation5], 0 }
   0x5   :  { %17 = vsyncpa [#allocation8], 0 }
   0x6   :  { %18 = vsyncpa [#allocation6], 0 }
   0x7   :  { %20 = vsyncpa [#allocation6 + $0x1], 0 }
   0x8   :  { %21 = vsyncpa [#allocation11], 0 }
   0x9   :  { %23 = vsyncpa [#allocation11 + $0x1], 0  ;;  %s3255_s13 = smov 0   ;;  %s3257_s14 = smov 0  }
   0xa   :  { %s3259_s15 = smov 0   ;;  %s3261_s16 = smov 0  }
   0xb LB: > { %4703 = sst [smem:[#allocation17_spill]] %s3182_s15  ;;  %s3276_s17 = sadd.s32 4294967295, %s3186_s16   ;;  %s3186_s16 = sphi %s3261_s16, %s4918_s16   ;;  %s3182_s15 = sphi %s3259_s15, %s4915_s15   ;;  %s3178_s14 = sphi %s3257_s14, %s4917_s14   ;;  %s3174_s13 = sphi %s3255_s13, %s4916_s13  }
   0xc   : > { %s4601_s18 = sadd.s32 4294967294, %s3186_s16   ;;  %s3280_s19 = sadd.s32 1, %s3186_s16  }
   0xd   : > { %s219_s20 = sadd.s32 1, %s3182_s15  ;;  %s216_s21 = ssub.s32 %s3186_s16, %s3280_s19 }
   0xe   : > { %p229_p0 = scmp.ne.s32.totalorder %s3182_s15, %s3178_s14  ;;  %p217_p1 = scmp.eq.s32.totalorder %s216_s21, 0 }
   0xf   : > { %p230_p2 = scmp.eq.s32.totalorder %s3276_s17, 1  ;;  %p235_p3 = scmp.ne.s32.totalorder %s3178_s14, %s3174_s13 }
  0x10   : > { %p236_p4 = scmp.eq.s32.totalorder %s4601_s18, 1  ;;  %p2607_p7 = scmp.ge.s32.totalorder %s3186_s16, 1 }
  0x11   : > { %s3293_s22 = scalar_select %p217_p1, %s3182_s15, %s219_s20  }
  0x12   : > { %p3295_p5 = por %p230_p2, %p229_p0  ;;  %p3299_p6 = por %p236_p4, %p235_p3 }
  0x13   : > { %4704 = sst [smem:[#allocation18_spill]] %s3293_s22  ;;  %p295_p8 = scmp.lt.s32.totalorder %s3186_s16, 3 }
  0x14   : > { %s4706_s24 = scalar_select %p3299_p6, 1, 0 }
  0x15   : > { %p4600_p9 = scmp.eq.s32.totalorder %s3276_s17, 0  ;;  %p3306_p10 = pnand %p2607_p7, %p295_p8 }
  0x16   : > { %s3188_s26 = smov [#allocation4]   ;;  %s3189_s29 = smov [#allocation7]  }
  0x17   : > { %s313_s27 = sshll.u32 %s3188_s26, 4  ;;  %p2755_p11 = pneg %p3306_p10  ;;  %s314_s27 = int_to_ptr.vmem [resolvable:$true] %s313_s27 }
  0x18   : > { %s326_s30 = sshll.u32 %s3189_s29, 4  ;;  %s3021_s11 = scalar_lea.vmem %s314_s27, 8192  ;;  %s327_s30 = int_to_ptr.vmem [resolvable:$true] %s326_s30 }
  0x19   : > { %p3314_p12 = pnand %p4600_p9, %p2755_p11  ;;  %p3022_p0 = scmp.ne.s32.totalorder %s314_s27, %s3021_s11 }
  0x1a   : > { %p3029_p3 = scmp.lt.s32.totalorder %s314_s27, %s314_s27  ;;  %p3030_p4 = scmp.lt.s32.totalorder %s3021_s11, %s3021_s11 }
  0x1b   : > { %p3012_p13 = pneg %p3314_p12 }
  0x1c   : > { %p3031_p7 = por %p3030_p4, %p3029_p3 }
  0x1d   : > { %p3024_p1 = pnand %p3022_p0, %p3012_p13 }
  0x1f   : > { %p3025_p2 = pneg %p3024_p1 }
  0x21   : > { %p3032_p8 = pnand %p3031_p7, %p3025_p2 }
  0x23   : > { %3035 = shalt.err (!%p3032_p8)
}
  0x24   : > { %s3190_s12 = smov 512   ;;  %s3191_s20 = smov 32  }
  0x25   : > { %2758 = dma.hbm_to_vmem [thread:$0]  (!%p3314_p12), %s4594_s5, 8192, %s314_s27, [#allocation5], %s3190_s12, %s3190_s12, %s3191_s20  }
  0x26   : > { %s3047_s29 = scalar_lea.vmem %s327_s30, 2048  ;;  %p3055_p9 = scmp.lt.s32.totalorder %s327_s30, %s327_s30 }
  0x27   : > { %p3048_p11 = scmp.ne.s32.totalorder %s327_s30, %s3047_s29  ;;  %p3056_p6 = scmp.lt.s32.totalorder %s3047_s29, %s3047_s29 }
  0x29   : > { %p3050_p0 = pnand %p3048_p11, %p3012_p13  ;;  %p3057_p3 = por %p3056_p6, %p3055_p9 }
  0x2b   : > { %p3051_p1 = pneg %p3050_p0 }
  0x2d   : > { %p3058_p2 = pnand %p3057_p3, %p3051_p1 }
  0x2f   : > { %3061 = shalt.err (!%p3058_p2)
}
  0x30   : > { %s3192_s11 = smov 128   ;;  %s3193_s18 = smov 8  }
  0x31   : > { %2761 = dma.hbm_to_vmem [thread:$0]  (!%p3314_p12), %s4595_s6, 2048, %s327_s30, [#allocation8], %s3192_s11, %s3192_s11, %s3193_s18  }
  0x32   : > { %367 = sbr.rel (%p3306_p10) target bundleno = 2321 (0x911), region = 52 }
  0x37   : > { %p4709_p4 = scmp.eq.s32.totalorder %s3276_s17, 0 }
  0x39   : > { %3157 = dma.done.wait (%p4709_p4), [#allocation5], 8192   ;;  %p4710_p13 = pmov %p4709_p4 }
  0x3a   : > { %p4711_p6 = pmov %p4709_p4 }
  0x3b   : > { %3159 = vsyncadd (%p4710_p13), [#allocation5], 4294959104 }
  0x3c   : > { %3161 = dma.done.wait (%p4711_p6), [#allocation8], 2048   ;;  %p4712_p9 = pmov %p4709_p4 }
  0x3d   : > { %p427_p7 = scmp.lt.s32.totalorder %s3276_s17, 1  ;;  %v4609_v0 = vmov 0.0   ;;  %v463_v1 = vld [vmem:[%s4592_s3 + $0x78] sm:$0xff]  ;;  %v462_v2 = vld [vmem:[%s4592_s3 + $0x70] sm:$0xff]  ;;  %s4713_s0 = sld [smem:[#allocation73_spill]]  ;;  %vm486_vm0 = vcmask 261120  }
  0x3e   : > { %3163 = vsyncadd (%p4712_p9), [#allocation8], 4294965248  ;;  %688 = vmatprep.mubr.f32.mxu1 %v4609_v0  ;;  %575 = vmatprep.mubr.f32.mxu0 %v4609_v0  ;;  %v459_v3 = vld [vmem:[%s4592_s3 + $0x58] sm:$0xff]  ;;  %v458_v4 = vld [vmem:[%s4592_s3 + $0x50] sm:$0xff]  ;;  %s4726_s1 = sld [smem:[#allocation74_spill]]  ;;  %s4699_s20 = sshll.u32 %s3276_s17, 7 }
  0x3f   : > { %s3350_s15 = scalar_select %p427_p7, %s3276_s17, 1  ;;  %648 = vmatprep.subr.mxu1 %v463_v1  ;;  %v455_v5 = vld [vmem:[%s4592_s3 + $0x38] sm:$0xff]  ;;  %v454_v6 = vld [vmem:[%s4592_s3 + $0x30] sm:$0xff]  ;;  %v3385_v10 = vld [vmem:[#allocation4 + $0x1e8] sm:$0xff] }
  0x40   : > { %649 = vmatpush1.msra.mxu1 %v462_v2  ;;  %v451_v7 = vld [vmem:[%s4592_s3 + $0x18] sm:$0xff]  ;;  %v450_v8 = vld [vmem:[%s4592_s3 + $0x10] sm:$0xff]  ;;  %4714 = vst [vmem:[#allocation19_spill] sm:$0xff] %v3385_v10  ;;  %v3387_v11 = vld [vmem:[#allocation4 + $0x1e0] sm:$0xff]  ;;  %s4769_s2 = sld [smem:[#allocation75_spill]] }
  0x41   : > { %s2671_s12 = sshll.u32 %s3350_s15, 6  ;;  %650 = vmatprep.subr.mxu1 %v459_v3  ;;  %v3389_v12 = vld [vmem:[#allocation4 + $0x1c8] sm:$0xff]  ;;  %v3394_v13 = vld [vmem:[#allocation4 + $0x1c0] sm:$0xff]  ;;  %s2619_s22 = sshll.u32 %s3350_s15, 3  ;;  %v3561_v58 = vld [vmem:[#allocation4 + $0x1f8] sm:$0xff] }
  0x42   : > { %651 = vmatpush1.msra.mxu1 %v458_v4  ;;  %v3401_v15 = vld [vmem:[#allocation4 + $0x1a8] sm:$0xff]  ;;  %v3404_v16 = vld [vmem:[#allocation4 + $0x1a0] sm:$0xff]  ;;  %4729 = vst [vmem:[#allocation33_spill] sm:$0xff] %v3561_v58  ;;  %v3564_v59 = vld [vmem:[#allocation4 + $0x1f0] sm:$0xff]  ;;  %s4466_s15 = sand.u32 1, %s3178_s14  }
  0x43   : > { %s3374_s27 = scalar_lea.vmem %s4713_s0, %s2671_s12  ;;  %652 = vmatprep.subr.mxu1 %v455_v5  ;;  %v3407_v17 = vld [vmem:[#allocation4 + $0x188] sm:$0xff]  ;;  %v3415_v19 = vld [vmem:[#allocation4 + $0x180] sm:$0xff]  ;;  %v3568_v60 = vld [vmem:[#allocation4 + $0x1d8] sm:$0xff]  ;;  %s2614_s29 = sshll.u32 %s4466_s15, 6 }
  0x44   : > { %653 = vmatpush1.msra.mxu1 %v454_v6  ;;  %v3383_v9 = vld [vmem:[%s3374_s27] sm:$0xff]  ;;  %v3399_v14 = vld [vmem:[%s3374_s27 + $0x8] sm:$0xff]  ;;  %v3423_v21 = vld [vmem:[%s3374_s27 + $0x10] sm:$0xff]  ;;  %s435_s30 = scalar_lea.vmem %s4726_s1, %s2619_s22  ;;  %s2615_s25 = sshll.u32 %s4466_s15, 3 }
  0x45   : > { %654 = vmatprep.subr.mxu1 %v451_v7  ;;  %v461_v18 = vld [vmem:[%s4592_s3 + $0x68] sm:$0xff]  ;;  %v460_v20 = vld [vmem:[%s4592_s3 + $0x60] sm:$0xff]  ;;  %v3447_v28 = vld [vmem:[%s3374_s27 + $0x18] sm:$0xff]  ;;  %s4487_s28 = scalar_lea.vmem [#allocation12], %s2615_s25  ;;  %s3195_s0 = smov [#allocation10]  }
  0x46   : > { %655 = vmatpush1.msra.mxu1 %v450_v8  ;;  %v3425_v22 = vld [vmem:[#allocation4 + $0x168] sm:$0xff]  ;;  %v3428_v23 = vld [vmem:[#allocation4 + $0x160] sm:$0xff]  ;;  %535 = vmatprep.subr.mxu0 %v461_v18  ;;  %v3513_v47 = vld [vmem:[%s3374_s27 + $0x30] sm:$0xff]  ;;  %s439_s26 = scalar_lea.vmem %s4769_s2, %s2619_s22  ;;  %s4475_s22 = scalar_lea.vmem [#allocation9], %s2614_s29 }
  0x47   : > { %2629 = vmatmul.mubr.msk.f32.vlgmr.msra.gmra.mxu1 %vm486_vm0, %v3383_v9  ;;  %842 = vmatprep.subr.mxu1 %v3385_v10  ;;  %v3431_v24 = vld [vmem:[#allocation4 + $0x148] sm:$0xff]  ;;  %v3439_v26 = vld [vmem:[#allocation4 + $0x140] sm:$0xff]  ;;  %v3535_v52 = vld [vmem:[%s3374_s27 + $0x38] sm:$0xff]  ;;  %s3066_s1 = sshll.u32 %s3195_s0, 4  ;;  %s3067_s1 = int_to_ptr.vmem [resolvable:$false] %s3066_s1 }
  0x48   : > { %843 = vmatpush1.msra.mxu1 %v3387_v11  ;;  %694 = vmatprep.mubr.f32.mxu1 %v4609_v0  ;;  %v457_v25 = vld [vmem:[%s4592_s3 + $0x48] sm:$0xff]  ;;  %v456_v27 = vld [vmem:[%s4592_s3 + $0x40] sm:$0xff]  ;;  %v3574_v61 = vld [vmem:[#allocation4 + $0x1d0] sm:$0xff] }
  0x49   : > { %844 = vmatprep.subr.mxu1 %v3389_v12  ;;  %536 = vmatpush1.msra.mxu0 %v460_v20  ;;  %v3449_v29 = vld [vmem:[#allocation4 + $0x128] sm:$0xff]  ;;  %v3452_v30 = vld [vmem:[#allocation4 + $0x120] sm:$0xff]  ;;  %v3577_v62 = vld [vmem:[#allocation4 + $0x1b8] sm:$0xff] }
  0x4a   : > { %845 = vmatpush1.msra.mxu1 %v3394_v13  ;;  %537 = vmatprep.subr.mxu0 %v457_v25  ;;  %v3455_v31 = vld [vmem:[#allocation4 + $0x108] sm:$0xff]  ;;  %v3463_v33 = vld [vmem:[#allocation4 + $0x100] sm:$0xff]  ;;  %v3581_v63 = vld [vmem:[#allocation4 + $0x1b0] sm:$0xff] }
  0x4b   : > { %2630 = vmatmul.mubr.msk.f32.gmra.mxu1 %vm486_vm0, %v3399_v14  ;;  %846 = vmatprep.subr.mxu1 %v3401_v15  ;;  %v453_v32 = vld [vmem:[%s4592_s3 + $0x28] sm:$0xff]  ;;  %4715 = vst [vmem:[#allocation20_spill] sm:$0xff] %v3463_v33  ;;  %v452_v34 = vld [vmem:[%s4592_s3 + $0x20] sm:$0xff]  ;;  %v3585_v1 = vld [vmem:[#allocation4 + $0x198] sm:$0xff] }
  0x4c   : > { %847 = vmatpush1.msra.mxu1 %v3404_v16  ;;  %700 = vmatprep.mubr.f32.mxu1 %v4609_v0  ;;  %v3471_v35 = vld [vmem:[%s3374_s27 + $0x20] sm:$0xff]  ;;  %v3473_v36 = vld [vmem:[#allocation4 + $0xe8] sm:$0xff]  ;;  %v3589_v2 = vld [vmem:[#allocation4 + $0x190] sm:$0xff] }
  0x4d   : > { %848 = vmatprep.subr.mxu1 %v3407_v17  ;;  %538 = vmatpush1.msra.mxu0 %v456_v27  ;;  %4716 = vst [vmem:[#allocation21_spill] sm:$0xff] %v3473_v36  ;;  %v3476_v37 = vld [vmem:[#allocation4 + $0xe0] sm:$0xff]  ;;  %v3479_v38 = vld [vmem:[#allocation4 + $0xc8] sm:$0xff]  ;;  %v3593_v3 = vld [vmem:[#allocation4 + $0x178] sm:$0xff] }
  0x4e   : > { %849 = vmatpush1.msra.mxu1 %v3415_v19  ;;  %4717 = vst [vmem:[#allocation22_spill] sm:$0xff] %v3476_v37  ;;  %539 = vmatprep.subr.mxu0 %v453_v32  ;;  %4718 = vst [vmem:[#allocation23_spill] sm:$0xff] %v3479_v38  ;;  %v449_v39 = vld [vmem:[%s4592_s3 + $0x8] sm:$0xff]  ;;  %v3487_v40 = vld [vmem:[#allocation4 + $0xc0] sm:$0xff] }
  0x4f   : > { %2631 = vmatmul.mubr.msk.f32.gmra.mxu1 %vm486_vm0, %v3423_v21  ;;  %850 = vmatprep.subr.mxu1 %v3425_v22  ;;  %v448_v41 = vld [vmem:[%s4592_s3] sm:$0xff]  ;;  %v3495_v42 = vld [vmem:[%s3374_s27 + $0x28] sm:$0xff]  ;;  %v3597_v4 = vld [vmem:[#allocation4 + $0x170] sm:$0xff]  ;;  %s2385_s27 = sand.u32 1, %s3276_s17  }
  0x50   : > { %851 = vmatpush1.msra.mxu1 %v3428_v23  ;;  %706 = vmatprep.mubr.f32.mxu1 %v4609_v0  ;;  %v3497_v43 = vld [vmem:[#allocation4 + $0xa8] sm:$0xff]  ;;  %v3500_v44 = vld [vmem:[#allocation4 + $0xa0] sm:$0xff]  ;;  %v3601_v5 = vld [vmem:[#allocation4 + $0x158] sm:$0xff]  ;;  %s4500_s11 = scalar_lea.sflag [#allocation11], %s2385_s27 }
  0x51   : > { %852 = vmatprep.subr.mxu1 %v3431_v24  ;;  %540 = vmatpush1.msra.mxu0 %v452_v34  ;;  %v3503_v45 = vld [vmem:[#allocation4 + $0x88] sm:$0xff]  ;;  %v3508_v46 = vld [vmem:[#allocation4 + $0x80] sm:$0xff]  ;;  %v3606_v6 = vld [vmem:[#allocation4 + $0x150] sm:$0xff] }
  0x52   : > { %853 = vmatpush1.msra.mxu1 %v3439_v26  ;;  %541 = vmatprep.subr.mxu0 %v449_v39  ;;  %4719 = vst [vmem:[#allocation24_spill] sm:$0xff] %v3508_v46  ;;  %v3515_v48 = vld [vmem:[#allocation4 + $0x68] sm:$0xff]  ;;  %v3518_v49 = vld [vmem:[#allocation4 + $0x60] sm:$0xff]  ;;  %v3610_v7 = vld [vmem:[#allocation4 + $0x138] sm:$0xff] }
  0x53   : > { %2632 = vmatmul.mubr.msk.f32.gmra.mxu1 %vm486_vm0, %v3447_v28  ;;  %854 = vmatprep.subr.mxu1 %v3449_v29  ;;  %4720 = vst [vmem:[#allocation25_spill] sm:$0xff] %v3515_v48  ;;  %4721 = vst [vmem:[#allocation26_spill] sm:$0xff] %v3518_v49  ;;  %v3523_v50 = vld [vmem:[#allocation4 + $0x48] sm:$0xff]  ;;  %v3530_v51 = vld [vmem:[#allocation4 + $0x40] sm:$0xff] }
  0x54   : > { %855 = vmatpush1.msra.mxu1 %v3452_v30  ;;  %712 = vmatprep.mubr.f32.mxu1 %v4609_v0  ;;  %4722 = vst [vmem:[#allocation27_spill] sm:$0xff] %v3523_v50  ;;  %4723 = vst [vmem:[#allocation28_spill] sm:$0xff] %v3530_v51  ;;  %v3537_v53 = vld [vmem:[#allocation4 + $0x28] sm:$0xff]  ;;  %v3540_v54 = vld [vmem:[#allocation4 + $0x20] sm:$0xff] }
  0x55   : > { %856 = vmatprep.subr.mxu1 %v3455_v31  ;;  %542 = vmatpush1.msra.mxu0 %v448_v41  ;;  %4724 = vst [vmem:[#allocation29_spill] sm:$0xff] %v3537_v53  ;;  %4725 = vst [vmem:[#allocation30_spill] sm:$0xff] %v3540_v54  ;;  %v3549_v55 = vld [vmem:[#allocation4 + $0x8] sm:$0xff]  ;;  %v3555_v56 = vld [vmem:[#allocation4] sm:$0xff] }
  0x56   : > { %857 = vmatpush1.msra.mxu1 %v3463_v33  ;;  %2621 = vmatmul.mubr.msk.f32.vlgmr.msra.gmra.mxu0 %vm486_vm0, %v3383_v9  ;;  %4727 = vst [vmem:[#allocation31_spill] sm:$0xff] %v3549_v55  ;;  %4728 = vst [vmem:[#allocation32_spill] sm:$0xff] %v3555_v56  ;;  %v3559_v57 = vld [vmem:[%s435_s30] sm:$0xff]  ;;  %v3614_v8 = vld [vmem:[#allocation4 + $0x130] sm:$0xff]  ;;  %s419_s30 = scalar_lea.vmem [#allocation10], %s2615_s25  ;;  %s3068_s25 = scalar_lea.vmem %s3067_s1, 256 }
  0x57   : > { %2633 = vmatmul.mubr.msk.f32.gmra.mxu1 %vm486_vm0, %v3471_v35  ;;  %858 = vmatprep.subr.mxu1 %v3473_v36  ;;  %v3618_v9 = vld [vmem:[#allocation4 + $0x118] sm:$0xff]  ;;  %v3631_v20 = vld [vmem:[#allocation4 + $0xf0] sm:$0xff]  ;;  %s2420_s29 = sshll.u32 %s419_s30, 4  ;;  %s2421_s29 = int_to_ptr.vmem [resolvable:$true] %s2420_s29 }
  0x58   : > { %859 = vmatpush1.msra.mxu1 %v3476_v37  ;;  %718 = vmatprep.mubr.f32.mxu1 %v4609_v0  ;;  %v3626_v18 = vld [vmem:[#allocation4 + $0xf8] sm:$0xff]  ;;  %v3639_v25 = vld [vmem:[#allocation4 + $0xd0] sm:$0xff]  ;;  %s3062_s18 = scalar_lea.vmem %s2421_s29, 128  ;;  %p3069_p11 = scmp.lt.s32.totalorder %s2421_s29, %s3067_s1 }
  0x59   : > { %860 = vmatprep.subr.mxu1 %v3479_v38  ;;  %1016 = vmatprep.subr.mxu0 %v3385_v10  ;;  %v3643_v27 = vld [vmem:[#allocation4 + $0xb8] sm:$0xff]  ;;  %v3656_v34 = vld [vmem:[#allocation4 + $0x90] sm:$0xff]  ;;  %p3063_p10 = scmp.ne.s32.totalorder %s2421_s29, %s3062_s18  ;;  %p3070_p0 = scmp.lt.s32.totalorder %s3068_s25, %s3062_s18 }
  0x5a   : > { %861 = vmatpush1.msra.mxu1 %v3487_v40  ;;  %1017 = vmatpush1.msra.mxu0 %v3387_v11  ;;  %v3651_v32 = vld [vmem:[#allocation4 + $0x98] sm:$0xff]  ;;  %4731 = vst [vmem:[#allocation35_spill] sm:$0xff] %v3656_v34  ;;  %v3664_v41 = vld [vmem:[#allocation4 + $0x70] sm:$0xff] }
  0x5b   : > { %2634 = vmatmul.mubr.msk.f32.gmra.mxu1 %vm486_vm0, %v3495_v42  ;;  %862 = vmatprep.subr.mxu1 %v3497_v43  ;;  %4730 = vst [vmem:[#allocation34_spill] sm:$0xff] %v3651_v32  ;;  %v3660_v39 = vld [vmem:[#allocation4 + $0x78] sm:$0xff]  ;;  %4733 = vst [vmem:[#allocation37_spill] sm:$0xff] %v3664_v41  ;;  %p3064_p12 = pnand %p3063_p10, %p3295_p5  ;;  %p3071_p1 = por %p3070_p0, %p3069_p11 }
  0x5c   : > { %863 = vmatpush1.msra.mxu1 %v3500_v44  ;;  %724 = vmatprep.mubr.f32.mxu1 %v4609_v0  ;;  %4732 = vst [vmem:[#allocation36_spill] sm:$0xff] %v3660_v39 }
  0x5d   : > { %864 = vmatprep.subr.mxu1 %v3503_v45  ;;  %581 = vmatprep.mubr.f32.mxu0 %v4609_v0  ;;  %p3065_p8 = pneg %p3064_p12 }
  0x5e   : > { %865 = vmatpush1.msra.mxu1 %v3508_v46  ;;  %1018 = vmatprep.subr.mxu0 %v3389_v12 }
  0x5f   : > { %2635 = vmatmul.mubr.msk.f32.gmra.mxu1 %vm486_vm0, %v3513_v47  ;;  %866 = vmatprep.subr.mxu1 %v3515_v48  ;;  %p3072_p3 = pnand %p3071_p1, %p3065_p8 }
  0x60   : > { %867 = vmatpush1.msra.mxu1 %v3518_v49  ;;  %730 = vmatprep.mubr.f32.mxu1 %v4609_v0 }
  0x61   : > { %868 = vmatprep.subr.mxu1 %v3523_v50  ;;  %2622 = vmatmul.mubr.msk.f32.gmra.mxu0 %vm486_vm0, %v3399_v14  ;;  %v3622_v14 = vld [vmem:[#allocation4 + $0x110] sm:$0xff] }
  0x62   : > { %869 = vmatpush1.msra.mxu1 %v3530_v51  ;;  %1019 = vmatpush1.msra.mxu0 %v3394_v13 }
  0x63   : > { %2636 = vmatmul.mubr.msk.f32.gmra.mxu1 %vm486_vm0, %v3535_v52  ;;  %870 = vmatprep.subr.mxu1 %v3537_v53 }
  0x64   : > { %871 = vmatpush1.msra.mxu1 %v3540_v54  ;;  %906 = vmatprep.mubr.f32.mxu1 %v4609_v0 }
  0x65   : > { %872 = vmatprep.subr.mxu1 %v3549_v55  ;;  %1020 = vmatprep.subr.mxu0 %v3401_v15 }
  0x66   : > { %873 = vmatpush1.msra.mxu1 %v3555_v56  ;;  %1021 = vmatpush1.msra.mxu0 %v3404_v16 }
  0x67   : > { %907 = vmatmul.mubr.f32.vlgmr.msra.gmra.mxu1 %v3559_v57  ;;  %913 = vmatprep.subr.mxu1 %v3561_v58 }
  0x68   : > { %914 = vmatpush1.msra.mxu1 %v3564_v59  ;;  %977 = vmatprep.mubr.f32.mxu1 %v4609_v0 }
  0x69   : > { %915 = vmatprep.subr.mxu1 %v3568_v60  ;;  %587 = vmatprep.mubr.f32.mxu0 %v4609_v0 }
  0x6a   : > { %916 = vmatpush1.msra.mxu1 %v3574_v61  ;;  %1022 = vmatprep.subr.mxu0 %v3407_v17 }
  0x6b   : > { %917 = vmatprep.subr.mxu1 %v3577_v62  ;;  %2623 = vmatmul.mubr.msk.f32.gmra.mxu0 %vm486_vm0, %v3423_v21  ;;  %v3635_v21 = vld [vmem:[#allocation4 + $0xd8] sm:$0xff] }
  0x6c   : > { %918 = vmatpush1.msra.mxu1 %v3581_v63  ;;  %1023 = vmatpush1.msra.mxu0 %v3415_v19 }
  0x6d   : > { %919 = vmatprep.subr.mxu1 %v3585_v1  ;;  %1024 = vmatprep.subr.mxu0 %v3425_v22 }
  0x6e   : > { %920 = vmatpush1.msra.mxu1 %v3589_v2  ;;  %1025 = vmatpush1.msra.mxu0 %v3428_v23 }
  0x6f   : > { %921 = vmatprep.subr.mxu1 %v3593_v3  ;;  %593 = vmatprep.mubr.f32.mxu0 %v4609_v0 }
  0x70   : > { %922 = vmatpush1.msra.mxu1 %v3597_v4  ;;  %1026 = vmatprep.subr.mxu0 %v3431_v24 }
  0x71   : > { %923 = vmatprep.subr.mxu1 %v3601_v5  ;;  %2624 = vmatmul.mubr.msk.f32.gmra.mxu0 %vm486_vm0, %v3447_v28  ;;  %v3647_v28 = vld [vmem:[#allocation4 + $0xb0] sm:$0xff] }
  0x72   : > { %924 = vmatpush1.msra.mxu1 %v3606_v6  ;;  %1027 = vmatpush1.msra.mxu0 %v3439_v26 }
  0x73   : > { %925 = vmatprep.subr.mxu1 %v3610_v7  ;;  %1028 = vmatprep.subr.mxu0 %v3449_v29 }
  0x74   : > { %926 = vmatpush1.msra.mxu1 %v3614_v8  ;;  %1029 = vmatpush1.msra.mxu0 %v3452_v30 }
  0x75   : > { %927 = vmatprep.subr.mxu1 %v3618_v9  ;;  %599 = vmatprep.mubr.f32.mxu0 %v4609_v0 }
  0x76   : > { %928 = vmatpush1.msra.mxu1 %v3622_v14  ;;  %1030 = vmatprep.subr.mxu0 %v3455_v31 }
  0x77   : > { %929 = vmatprep.subr.mxu1 %v3626_v18  ;;  %2625 = vmatmul.mubr.msk.f32.gmra.mxu0 %vm486_vm0, %v3471_v35  ;;  %v3668_v35 = vld [vmem:[#allocation4 + $0x58] sm:$0xff] }
  0x78   : > { %930 = vmatpush1.msra.mxu1 %v3631_v20  ;;  %1031 = vmatpush1.msra.mxu0 %v3463_v33  ;;  %4734 = vst [vmem:[#allocation38_spill] sm:$0xff] %v3668_v35  ;;  %v3672_v33 = vld [vmem:[#allocation4 + $0x50] sm:$0xff] }
  0x79   : > { %931 = vmatprep.subr.mxu1 %v3635_v21  ;;  %1032 = vmatprep.subr.mxu0 %v3473_v36  ;;  %4735 = vst [vmem:[#allocation39_spill] sm:$0xff] %v3672_v33  ;;  %v3676_v36 = vld [vmem:[#allocation4 + $0x38] sm:$0xff] }
  0x7a   : > { %932 = vmatpush1.msra.mxu1 %v3639_v25  ;;  %1033 = vmatpush1.msra.mxu0 %v3476_v37  ;;  %4736 = vst [vmem:[#allocation40_spill] sm:$0xff] %v3676_v36  ;;  %v3681_v37 = vld [vmem:[#allocation4 + $0x30] sm:$0xff] }
  0x7b   : > { %933 = vmatprep.subr.mxu1 %v3643_v27  ;;  %605 = vmatprep.mubr.f32.mxu0 %v4609_v0  ;;  %4737 = vst [vmem:[#allocation41_spill] sm:$0xff] %v3681_v37  ;;  %v3685_v0 = vld [vmem:[#allocation4 + $0x18] sm:$0xff] }
  0x7c   : > { %934 = vmatpush1.msra.mxu1 %v3647_v28  ;;  %1034 = vmatprep.subr.mxu0 %v3479_v38  ;;  %4738 = vst [vmem:[#allocation42_spill] sm:$0xff] %v3685_v0  ;;  %v3689_v38 = vld [vmem:[#allocation4 + $0x10] sm:$0xff] }
  0x7d   : > { %935 = vmatprep.subr.mxu1 %v3651_v32  ;;  %2626 = vmatmul.mubr.msk.f32.gmra.mxu0 %vm486_vm0, %v3495_v42  ;;  %4739 = vst [vmem:[#allocation43_spill] sm:$0xff] %v3689_v38  ;;  %v4740_v42 = vmov 0.0  }
  0x7e   : > { %936 = vmatpush1.msra.mxu1 %v3656_v34  ;;  %1035 = vmatpush1.msra.mxu0 %v3487_v40 }
  0x7f   : > { %937 = vmatprep.subr.mxu1 %v3660_v39  ;;  %1036 = vmatprep.subr.mxu0 %v3497_v43 }
  0x80   : > { %938 = vmatpush1.msra.mxu1 %v3664_v41  ;;  %1037 = vmatpush1.msra.mxu0 %v3500_v44 }
  0x81   : > { %939 = vmatprep.subr.mxu1 %v3668_v35  ;;  %611 = vmatprep.mubr.f32.mxu0 %v4740_v42 }
  0x82   : > { %940 = vmatpush1.msra.mxu1 %v3672_v33  ;;  %1038 = vmatprep.subr.mxu0 %v3503_v45 }
  0x83   : > { %941 = vmatprep.subr.mxu1 %v3676_v36  ;;  %2627 = vmatmul.mubr.msk.f32.gmra.mxu0 %vm486_vm0, %v3513_v47  ;;  %v466_v47 = vlaneseq }
  0x84   : > { %942 = vmatpush1.msra.mxu1 %v3681_v37  ;;  %1039 = vmatpush1.msra.mxu0 %v3508_v46 }
  0x85   : > { %943 = vmatprep.subr.mxu1 %v3685_v0  ;;  %1040 = vmatprep.subr.mxu0 %v3515_v48 }
  0x86   : > { %944 = vmatpush1.msra.mxu1 %v3689_v38  ;;  %1041 = vmatpush1.msra.mxu0 %v3518_v49 }
  0x87   : > { %978 = vmatmul.mubr.f32.vlgmr.msra.gmra.mxu1 %v3559_v57  ;;  %1087 = vmatprep.subr.mxu1 %v3561_v58 }
  0x88   : > { %1088 = vmatpush1.msra.mxu1 %v3564_v59  ;;  %617 = vmatprep.mubr.f32.mxu0 %v4740_v42 }
  0x89   : > { %1089 = vmatprep.subr.mxu1 %v3568_v60  ;;  %1042 = vmatprep.subr.mxu0 %v3523_v50 }
  0x8a   : > { %1090 = vmatpush1.msra.mxu1 %v3574_v61  ;;  %2628 = vmatmul.mubr.msk.f32.gmra.mxu0 %vm486_vm0, %v3535_v52  ;;  %v467_v52 = vshrl.u32 %v466_v47, 7 }
  0x8b   : > { %1091 = vmatprep.subr.mxu1 %v3577_v62  ;;  %1043 = vmatpush1.msra.mxu0 %v3530_v51 }
  0x8c   : > { %1092 = vmatpush1.msra.mxu1 %v3581_v63  ;;  %1044 = vmatprep.subr.mxu0 %v3537_v53  ;;  %v476_v57 = vsub.s32 2, %v467_v52 }
  0x8d   : > { %1093 = vmatprep.subr.mxu1 %v3585_v1  ;;  %1045 = vmatpush1.msra.mxu0 %v3540_v54 }
  0x8e   : > { %1094 = vmatpush1.msra.mxu1 %v3589_v2  ;;  %1046 = vmatprep.subr.mxu0 %v3549_v55 }
  0x8f   : > { %1095 = vmatprep.subr.mxu1 %v3593_v3  ;;  %1047 = vmatpush1.msra.mxu0 %v3555_v56  ;;  %v480_v56 = vsub.s32 3, %v467_v52 }
  0x90   : > { %1096 = vmatpush1.msra.mxu1 %v3597_v4  ;;  %1080 = vmatprep.mubr.f32.mxu0 %v4740_v42 }
  0x91   : > { %1097 = vmatprep.subr.mxu1 %v3601_v5  ;;  %1151 = vmatprep.mubr.f32.mxu1 %v4740_v42 }
  0x92   : > { %1098 = vmatpush1.msra.mxu1 %v3606_v6  ;;  %1191 = vmatprep.subr.mxu0 %v3385_v10  ;;  %v464_v10 = vld [vmem:[%s4593_s4] sm:$0xf] }
  0x93   : > { %1099 = vmatprep.subr.mxu1 %v3610_v7  ;;  %v3755_v54 = vrot.slane %v464_v10, %v476_v57 }
  0x94   : > { %1100 = vmatpush1.msra.mxu1 %v3614_v8 }
  0x95   : > { %1101 = vmatprep.subr.mxu1 %v3618_v9 }
  0x96   : > { %1102 = vmatpush1.msra.mxu1 %v3622_v14 }
  0x97   : > { %1103 = vmatprep.subr.mxu1 %v3626_v18 }
  0x98   : > { %1104 = vmatpush1.msra.mxu1 %v3631_v20 }
  0x99   : > { %1105 = vmatprep.subr.mxu1 %v3635_v21 }
  0x9a   : > { %1106 = vmatpush1.msra.mxu1 %v3639_v25 }
  0x9b   : > { %1107 = vmatprep.subr.mxu1 %v3643_v27 }
  0x9c   : > { %1108 = vmatpush1.msra.mxu1 %v3647_v28 }
  0x9d   : > { %1109 = vmatprep.subr.mxu1 %v3651_v32 }
  0x9e   : > { %1110 = vmatpush1.msra.mxu1 %v3656_v34 }
  0x9f   : > { %1111 = vmatprep.subr.mxu1 %v3660_v39 }
  0xa0   : > { %1112 = vmatpush1.msra.mxu1 %v3664_v41 }
  0xa1   : > { %1113 = vmatprep.subr.mxu1 %v3668_v35 }
  0xa2   : > { %1114 = vmatpush1.msra.mxu1 %v3672_v33 }
  0xa3   : > { %1115 = vmatprep.subr.mxu1 %v3676_v36 }
  0xa4   : > { %1116 = vmatpush1.msra.mxu1 %v3681_v37 }
  0xa5   : > { %1117 = vmatprep.subr.mxu1 %v3685_v0  ;;  %v3757_v0 = vrot.slane %v464_v10, %v480_v56 }
  0xa6   : > { %1118 = vmatpush1.msra.mxu1 %v3689_v38 }
  0xa7   : > { %1262 = vmatprep.subr.mxu1 %v3561_v58 }
 0x107   : > { %v3751_v42 = vpop.f32.mrf.mxu1 }
 0x109   : > { %v3753_v55 = vpop.f32.mrf.mxu1 }
 0x10b   : > { %v696_v37 = vpop.f32.mrf.mxu1 }
 0x10c   : > { %v3760_v38 = vadd.f32 %v696_v37, %v3755_v54 }
 0x10d   : > { %v698_v58 = vpop.f32.mrf.mxu1 }
 0x10e   : > { %4741 = vst [vmem:[#allocation44_spill] sm:$0xff] %v3760_v38  ;;  %v3763_v47 = vadd.f32 %v698_v58, %v3757_v0 }
 0x10f   : > { %v702_v36 = vpop.f32.mrf.mxu1 }
 0x110   : > { %4742 = vst [vmem:[#allocation45_spill] sm:$0xff] %v3763_v47  ;;  %v3766_v53 = vadd.f32 %v702_v36, %v3755_v54 }
 0x111   : > { %v704_v33 = vpop.f32.mrf.mxu1 }
 0x112   : > { %4743 = vst [vmem:[#allocation46_spill] sm:$0xff] %v3766_v53  ;;  %v3769_v51 = vadd.f32 %v704_v33, %v3757_v0 }
 0x113   : > { %v708_v57 = vpop.f32.mrf.mxu1 }
 0x114   : > { %4744 = vst [vmem:[#allocation47_spill] sm:$0xff] %v3769_v51  ;;  %v3772_v35 = vadd.f32 %v708_v57, %v3755_v54 }
 0x115   : > { %v710_v56 = vpop.f32.mrf.mxu1 }
 0x116   : > { %4745 = vst [vmem:[#allocation48_spill] sm:$0xff] %v3772_v35  ;;  %v3775_v37 = vadd.f32 %v710_v56, %v3757_v0 }
 0x117   : > { %v714_v38 = vpop.f32.mrf.mxu1 }
 0x118   : > { %4746 = vst [vmem:[#allocation49_spill] sm:$0xff] %v3775_v37  ;;  %v3778_v58 = vadd.f32 %v714_v38, %v3755_v54  ;;  %v577_v37 = vpop.f32.mrf.mxu0 }
 0x119   : > { %v716_v47 = vpop.f32.mrf.mxu1 }
 0x11a   : > { %4747 = vst [vmem:[#allocation50_spill] sm:$0xff] %v3778_v58  ;;  %v3781_v36 = vadd.f32 %v716_v47, %v3757_v0  ;;  %v468_v58 = vsub.s32 0, %v467_v52 }
 0x11b   : > { %v720_v53 = vpop.f32.mrf.mxu1 }
 0x11c   : > { %4748 = vst [vmem:[#allocation51_spill] sm:$0xff] %v3781_v36  ;;  %v3784_v33 = vadd.f32 %v720_v53, %v3755_v54  ;;  %v472_v36 = vsub.s32 1, %v467_v52  ;;  %v579_v53 = vpop.f32.mrf.mxu0  ;;  %v3798_v49 = vrot.slane %v464_v10, %v468_v58 }
 0x11d   : > { %v722_v51 = vpop.f32.mrf.mxu1 }
 0x11e   : > { %4749 = vst [vmem:[#allocation52_spill] sm:$0xff] %v3784_v33  ;;  %v3787_v57 = vadd.f32 %v722_v51, %v3757_v0 }
 0x11f   : > { %v726_v35 = vpop.f32.mrf.mxu1 }
 0x120   : > { %4750 = vst [vmem:[#allocation53_spill] sm:$0xff] %v3787_v57  ;;  %v3790_v56 = vadd.f32 %v726_v35, %v3755_v54 }
 0x121   : > { %v728_v50 = vpop.f32.mrf.mxu1  ;;  %v3803_v35 = vpop.f32.mrf.mxu0 }
 0x122   : > { %4751 = vst [vmem:[#allocation54_spill] sm:$0xff] %v3790_v56  ;;  %v3793_v38 = vadd.f32 %v728_v50, %v3757_v0  ;;  %4755 = vst [vmem:[#allocation58_spill] sm:$0xff] %v3803_v35  ;;  %v3805_v56 = vrot.slane %v464_v10, %v472_v36  ;;  %v578_v50 = vadd.f32 %v577_v37, %v3798_v49 }
 0x123   : > { %v732_v47 = vpop.f32.mrf.mxu1 }
 0x124   : > { %4752 = vst [vmem:[#allocation55_spill] sm:$0xff] %v3793_v38  ;;  %v3796_v41 = vadd.f32 %v732_v47, %v3755_v54  ;;  %4756 = vst [vmem:[#allocation59_spill] sm:$0xff] %v3805_v56  ;;  %v3808_v38 = vpop.f32.mrf.mxu0  ;;  %v580_v52 = vadd.f32 %v579_v53, %v3805_v56 }
 0x125   : > { %v734_v33 = vpop.f32.mrf.mxu1  ;;  %4757 = vst [vmem:[#allocation60_spill] sm:$0xff] %v3808_v38 }
 0x126   : > { %4753 = vst [vmem:[#allocation56_spill] sm:$0xff] %v3796_v41  ;;  %v3801_v51 = vadd.f32 %v734_v33, %v3757_v0 }
 0x127   : > { %v908_v57 = vpop.f32.mrf.mxu1 }
 0x128   : > { %4754 = vst [vmem:[#allocation57_spill] sm:$0xff] %v3801_v51  ;;  %v909_v41 = vadd.f32 %v908_v57, %v578_v50 }
 0x129   : > { %v910_v47 = vpop.f32.mrf.mxu1 }
 0x12a   : > { %v911_v48 = vadd.f32 %v910_v47, %v580_v52  ;;  %v2637_v10 = vmul.f32 -1.442695, %v909_v41 }
 0x12b   : > { %v589_v39 = vpop.f32.mrf.mxu0 }
 0x12c   : > { %v3812_v58 = vadd.f32 %v589_v39, %v3798_v49  ;;  %v2638_v36 = vmul.f32 -1.442695, %v911_v48  ;;  %2818 = vpow2.f32 %v2637_v10 }
 0x12d   : > { %v591_v33 = vpop.f32.mrf.mxu0 }
 0x12e   : > { %4758 = vst [vmem:[#allocation61_spill] sm:$0xff] %v3812_v58  ;;  %v3815_v51 = vadd.f32 %v591_v33, %v3805_v56  ;;  %2820 = vpow2.f32 %v2638_v36  ;;  %v4789_v58 = vld [vmem:[#allocation32_spill] sm:$0xff] }
 0x130   : > { %4759 = vst [vmem:[#allocation62_spill] sm:$0xff] %v3815_v51  ;;  %v4788_v51 = vld [vmem:[#allocation42_spill] sm:$0xff] }
 0x131   : > { %v595_v35 = vpop.f32.mrf.mxu0 }
 0x132   : > { %v3818_v37 = vadd.f32 %v595_v35, %v3798_v49 }
 0x133   : > { %v597_v38 = vpop.f32.mrf.mxu0 }
 0x134   : > { %4760 = vst [vmem:[#allocation63_spill] sm:$0xff] %v3818_v37  ;;  %v3821_v57 = vadd.f32 %v597_v38, %v3805_v56  ;;  %v691_v38 = vadd.f32 %v3751_v42, %v3755_v54 }
 0x136   : > { %4761 = vst [vmem:[#allocation64_spill] sm:$0xff] %v3821_v57 }
 0x137   : > { %v601_v53 = vpop.f32.mrf.mxu0 }
 0x138   : > { %v3824_v39 = vadd.f32 %v601_v53, %v3798_v49 }
 0x139   : > { %v603_v50 = vpop.f32.mrf.mxu0  ;;  %v2819_v47 = vpop.eup %2818 }
 0x13a   : > { %4762 = vst [vmem:[#allocation65_spill] sm:$0xff] %v3824_v39  ;;  %v3827_v52 = vadd.f32 %v603_v50, %v3805_v56  ;;  %v993_v36 = vadd.f32 1.0, %v2819_v47 }
 0x13b   : > { %v2821_v10 = vpop.eup %2820 }
 0x13c   : > { %4763 = vst [vmem:[#allocation66_spill] sm:$0xff] %v3827_v52  ;;  %v994_v39 = vadd.f32 1.0, %v2821_v10  ;;  %2822 = vrcp.f32 %v993_v36 }
 0x13d   : > { %v607_v41 = vpop.f32.mrf.mxu0 }
 0x13e   : > { %v3830_v48 = vadd.f32 %v607_v41, %v3798_v49  ;;  %v693_v41 = vadd.f32 %v3753_v55, %v3757_v0  ;;  %2824 = vrcp.f32 %v994_v39 }
 0x13f   : > { %v609_v35 = vpop.f32.mrf.mxu0 }
 0x140   : > { %4764 = vst [vmem:[#allocation67_spill] sm:$0xff] %v3830_v48  ;;  %v3833_v33 = vadd.f32 %v609_v35, %v3805_v56 }
 0x142   : > { %4765 = vst [vmem:[#allocation68_spill] sm:$0xff] %v3833_v33 }
 0x143   : > { %v613_v53 = vpop.f32.mrf.mxu0 }
 0x144   : > { %v3838_v50 = vadd.f32 %v613_v53, %v3798_v49 }
 0x145   : > { %v615_v52 = vpop.f32.mrf.mxu0 }
 0x146   : > { %4766 = vst [vmem:[#allocation69_spill] sm:$0xff] %v3838_v50  ;;  %v3843_v35 = vadd.f32 %v615_v52, %v3805_v56  ;;  %v4787_v50 = vld [vmem:[#allocation31_spill] sm:$0xff] }
 0x147   : > { %v979_v57 = vpop.f32.mrf.mxu1 }
 0x148   : > { %v980_v48 = vadd.f32 %v979_v57, %v691_v38  ;;  %4767 = vst [vmem:[#allocation70_spill] sm:$0xff] %v3843_v35  ;;  %v834_v57 = vld [vmem:[%s439_s26] sm:$0xff]  ;;  %v4786_v35 = vld [vmem:[#allocation41_spill] sm:$0xff]  ;;  %s2418_s26 = scalar_lea.hbm %s4598_s9, %s4699_s20 }
 0x149   : > { %v981_v37 = vpop.f32.mrf.mxu1  ;;  %v2823_v0 = vpop.eup %2822 }
 0x14a   : > { %v2639_v33 = vmul.f32 -1.442695, %v980_v48  ;;  %v982_v54 = vadd.f32 %v981_v37, %v693_v41  ;;  %v619_v42 = vpop.f32.mrf.mxu0  ;;  %v1003_v48 = vmul.f32 %v2823_v0, %v834_v57  ;;  %v4771_v41 = vld [vmem:[#allocation20_spill] sm:$0xff]  ;;  %v4774_v0 = vld [vmem:[#allocation23_spill] sm:$0xff] }
 0x14b   : > { %v3846_v47 = vadd.f32 %v619_v42, %v3798_v49  ;;  %v2825_v55 = vpop.eup %2824  ;;  %v4773_v42 = vld [vmem:[#allocation22_spill] sm:$0xff]  ;;  %v4776_v57 = vld [vmem:[#allocation36_spill] sm:$0xff] }
 0x14c   : > { %2826 = vpow2.f32 %v2639_v33 }
 0x14d   : > { %2828 = vtanh.f32 %v982_v54  ;;  %4768 = vst [vmem:[#allocation71_spill] sm:$0xff] %v3846_v47  ;;  %v4772_v54 = vld [vmem:[#allocation21_spill] sm:$0xff]  ;;  %v4784_v47 = vld [vmem:[#allocation40_spill] sm:$0xff] }
 0x159   : > { %v2827_v52 = vpop.eup %2826 }
 0x15a   : > { %v2829_v10 = vpop.eup %2828  ;;  %v995_v38 = vadd.f32 1.0, %v2827_v52  ;;  %v4777_v52 = vld [vmem:[#allocation26_spill] sm:$0xff] }
 0x15b   : > { %v1004_v37 = vmul.f32 %v2829_v10, %v2825_v55  ;;  %v4775_v55 = vld [vmem:[#allocation25_spill] sm:$0xff] }
 0x15c   : > { %2830 = vrcp.f32 %v995_v38  ;;  %v4778_v10 = vld [vmem:[#allocation37_spill] sm:$0xff]  ;;  %v4779_v38 = vld [vmem:[#allocation27_spill] sm:$0xff] }
 0x15d   : > { %v3853_v39 = vadd.f32 %v1004_v37, %v1003_v48  ;;  %v4780_v48 = vld [vmem:[#allocation38_spill] sm:$0xff]  ;;  %v4781_v37 = vld [vmem:[#allocation28_spill] sm:$0xff] }
 0x15f   : > { %2832 = vtanh.f32 %v3853_v39 }
 0x169   : > { %v2831_v33 = vpop.eup %2830 }
 0x16c   : > { %v2833_v36 = vpop.eup %2832 }
 0x16d   : > { %v3856_v53 = vmul.f32 %v2833_v36, %v2831_v33  ;;  %v4782_v33 = vld [vmem:[#allocation39_spill] sm:$0xff]  ;;  %v4783_v36 = vld [vmem:[#allocation29_spill] sm:$0xff] }
 0x16f   : > { %4770 = vst [vmem:[#allocation72_spill] sm:$0xff] %v3856_v53  ;;  %1081 = vmatmul.mubr.f32.vlgmr.msra.gmra.mxu0 %v3856_v53  ;;  %1152 = vmatmul.mubr.f32.vlgmr.msra.gmra.mxu1 %v3856_v53  ;;  %v4785_v53 = vld [vmem:[#allocation30_spill] sm:$0xff] }
 0x170   : > { %1192 = vmatpush1.msra.mxu0 %v3387_v11  ;;  %1263 = vmatpush1.msra.mxu1 %v3564_v59 }
 0x171   : > { %1193 = vmatprep.subr.mxu0 %v3389_v12  ;;  %1264 = vmatprep.subr.mxu1 %v3568_v60 }
 0x172   : > { %1194 = vmatpush1.msra.mxu0 %v3394_v13  ;;  %1265 = vmatpush1.msra.mxu1 %v3574_v61 }
 0x173   : > { %1195 = vmatprep.subr.mxu0 %v3401_v15  ;;  %1266 = vmatprep.subr.mxu1 %v3577_v62 }
 0x174   : > { %1196 = vmatpush1.msra.mxu0 %v3404_v16  ;;  %1267 = vmatpush1.msra.mxu1 %v3581_v63 }
 0x175   : > { %1197 = vmatprep.subr.mxu0 %v3407_v17  ;;  %1268 = vmatprep.subr.mxu1 %v3585_v1 }
 0x176   : > { %1198 = vmatpush1.msra.mxu0 %v3415_v19  ;;  %1269 = vmatpush1.msra.mxu1 %v3589_v2 }
 0x177   : > { %1199 = vmatprep.subr.mxu0 %v3425_v22  ;;  %1270 = vmatprep.subr.mxu1 %v3593_v3 }
 0x178   : > { %1200 = vmatpush1.msra.mxu0 %v3428_v23  ;;  %1271 = vmatpush1.msra.mxu1 %v3597_v4 }
 0x179   : > { %1201 = vmatprep.subr.mxu0 %v3431_v24  ;;  %1272 = vmatprep.subr.mxu1 %v3601_v5 }
 0x17a   : > { %1202 = vmatpush1.msra.mxu0 %v3439_v26  ;;  %1273 = vmatpush1.msra.mxu1 %v3606_v6 }
 0x17b   : > { %1203 = vmatprep.subr.mxu0 %v3449_v29  ;;  %1274 = vmatprep.subr.mxu1 %v3610_v7 }
 0x17c   : > { %1204 = vmatpush1.msra.mxu0 %v3452_v30  ;;  %1275 = vmatpush1.msra.mxu1 %v3614_v8 }
 0x17d   : > { %1205 = vmatprep.subr.mxu0 %v3455_v31  ;;  %1276 = vmatprep.subr.mxu1 %v3618_v9 }
 0x17e   : > { %1206 = vmatpush1.msra.mxu0 %v4771_v41  ;;  %1277 = vmatpush1.msra.mxu1 %v3622_v14 }
 0x17f   : > { %1207 = vmatprep.subr.mxu0 %v4772_v54  ;;  %1278 = vmatprep.subr.mxu1 %v3626_v18 }
 0x180   : > { %1208 = vmatpush1.msra.mxu0 %v4773_v42  ;;  %1279 = vmatpush1.msra.mxu1 %v3631_v20 }
 0x181   : > { %1209 = vmatprep.subr.mxu0 %v4774_v0  ;;  %1280 = vmatprep.subr.mxu1 %v3635_v21 }
 0x182   : > { %1210 = vmatpush1.msra.mxu0 %v3487_v40  ;;  %1281 = vmatpush1.msra.mxu1 %v3639_v25 }
 0x183   : > { %1211 = vmatprep.subr.mxu0 %v3497_v43  ;;  %1282 = vmatprep.subr.mxu1 %v3643_v27 }
 0x184   : > { %1212 = vmatpush1.msra.mxu0 %v3500_v44  ;;  %1283 = vmatpush1.msra.mxu1 %v3647_v28 }
 0x185   : > { %1213 = vmatprep.subr.mxu0 %v3503_v45  ;;  %1284 = vmatprep.subr.mxu1 %v3651_v32 }
 0x186   : > { %1214 = vmatpush1.msra.mxu0 %v3508_v46  ;;  %1285 = vmatpush1.msra.mxu1 %v3656_v34  ;;  %v4798_v46 = vld [vmem:[#allocation45_spill] sm:$0xff] }
 0x187   : > { %1215 = vmatprep.subr.mxu0 %v4775_v55  ;;  %1286 = vmatprep.subr.mxu1 %v4776_v57 }
 0x188   : > { %1216 = vmatpush1.msra.mxu0 %v4777_v52  ;;  %1287 = vmatpush1.msra.mxu1 %v4778_v10 }
 0x189   : > { %1217 = vmatprep.subr.mxu0 %v4779_v38  ;;  %1288 = vmatprep.subr.mxu1 %v4780_v48  ;;  %v4790_v38 = vmov 0.0   ;;  %v4791_v48 = vld [vmem:[#allocation43_spill] sm:$0xff] }
 0x18a   : > { %1218 = vmatpush1.msra.mxu0 %v4781_v37  ;;  %1289 = vmatpush1.msra.mxu1 %v4782_v33  ;;  %v4792_v33 = vld [vmem:[#allocation19_spill] sm:$0xff] }
 0x18b   : > { %1219 = vmatprep.subr.mxu0 %v4783_v36  ;;  %1290 = vmatprep.subr.mxu1 %v4784_v47  ;;  %v4793_v36 = vld [vmem:[#allocation33_spill] sm:$0xff]  ;;  %v3926_v47 = vpop.f32.mrf.mxu0 }
 0x18c   : > { %1220 = vmatpush1.msra.mxu0 %v4785_v53  ;;  %1291 = vmatpush1.msra.mxu1 %v4786_v35  ;;  %4794 = vst [vmem:[#allocation20_spill] sm:$0xff] %v3926_v47  ;;  %v4795_v35 = vld [vmem:[#allocation58_spill] sm:$0xff] }
 0x18d   : > { %1221 = vmatprep.subr.mxu0 %v4787_v50  ;;  %1292 = vmatprep.subr.mxu1 %v4788_v51  ;;  %v584_v53 = vadd.f32 %v4795_v35, %v3798_v49  ;;  %v4796_v51 = vld [vmem:[#allocation60_spill] sm:$0xff] }
 0x18e   : > { %1222 = vmatpush1.msra.mxu0 %v4789_v58  ;;  %1255 = vmatprep.mubr.f32.mxu0 %v4790_v38  ;;  %v586_v37 = vadd.f32 %v4796_v51, %v3805_v56  ;;  %v4265_v56 = vld [vmem:[#allocation4 + $0x58] sm:$0xff] }
 0x18f   : > { %1293 = vmatpush1.msra.mxu1 %v4791_v48  ;;  %1326 = vmatprep.mubr.f32.mxu1 %v4790_v38 }
 0x190   : > { %1366 = vmatprep.subr.mxu0 %v4792_v33  ;;  %1437 = vmatprep.subr.mxu1 %v4793_v36  ;;  %v4797_v33 = vld [vmem:[#allocation44_spill] sm:$0xff] }
 0x22f   : > { %v1082_v50 = vpop.f32.mrf.mxu0  ;;  %v1153_v38 = vpop.f32.mrf.mxu1 }
 0x230   : > { %v1083_v58 = vadd.f32 %v1082_v50, %v584_v53  ;;  %v1154_v55 = vadd.f32 %v1153_v38, %v4797_v33  ;;  %v4823_v33 = vld [vmem:[#allocation62_spill] sm:$0xff] }
 0x231   : > { %v1084_v10 = vpop.f32.mrf.mxu0  ;;  %v1155_v36 = vpop.f32.mrf.mxu1 }
 0x232   : > { %v2640_v52 = vmul.f32 -1.442695, %v1083_v58  ;;  %v1085_v57 = vadd.f32 %v1084_v10, %v586_v37  ;;  %v2642_v34 = vmul.f32 -1.442695, %v1154_v55  ;;  %v1156_v32 = vadd.f32 %v1155_v36, %v4798_v46 }
 0x234   : > { %2834 = vpow2.f32 %v2640_v52  ;;  %v2641_v48 = vmul.f32 -1.442695, %v1085_v57 }
 0x236   : > { %2836 = vpow2.f32 %v2641_v48 }
 0x237   : > { %2838 = vpow2.f32 %v2642_v34 }
 0x241   : > { %v2835_v47 = vpop.eup %2834 }
 0x242   : > { %v1167_v49 = vadd.f32 1.0, %v2835_v47 }
 0x243   : > { %v2837_v35 = vpop.eup %2836 }
 0x244   : > { %2840 = vrcp.f32 %v1167_v49  ;;  %v1168_v51 = vadd.f32 1.0, %v2837_v35  ;;  %v2839_v58 = vpop.eup %2838 }
 0x245   : > { %2842 = vtanh.f32 %v1156_v32  ;;  %v1169_v52 = vadd.f32 1.0, %v2839_v58  ;;  %v4818_v32 = vmov 0.0   ;;  %v4824_v58 = vld [vmem:[#allocation46_spill] sm:$0xff] }
 0x246   : > { %2844 = vrcp.f32 %v1168_v51 }
 0x247   : > { %2846 = vrcp.f32 %v1169_v52 }
 0x251   : > { %v2841_v50 = vpop.eup %2840 }
 0x252   : > { %v2843_v53 = vpop.eup %2842  ;;  %v1177_v10 = vmul.f32 %v2841_v50, %v3853_v39  ;;  %v4819_v39 = vld [vmem:[#allocation43_spill] sm:$0xff] }
 0x253   : > { %v2845_v57 = vpop.eup %2844 }
 0x254   : > { %v1178_v38 = vmul.f32 %v2845_v57, %v2843_v53  ;;  %v2847_v46 = vpop.eup %2846 }
 0x256   : > { %v3935_v48 = vadd.f32 %v1178_v38, %v1177_v10  ;;  %v4825_v10 = vld [vmem:[#allocation47_spill] sm:$0xff] }
 0x258   : > { %2848 = vtanh.f32 %v3935_v48 }
 0x265   : > { %v2849_v47 = vpop.eup %2848 }
 0x266   : > { %v3938_v34 = vmul.f32 %v2849_v47, %v2847_v46 }
 0x268   : > { %4799 = vst [vmem:[#allocation21_spill] sm:$0xff] %v3938_v34  ;;  %1256 = vmatmul.mubr.f32.vlgmr.msra.gmra.mxu0 %v3938_v34  ;;  %1327 = vmatmul.mubr.f32.vlgmr.msra.gmra.mxu1 %v3938_v34  ;;  %v4277_v34 = vld [vmem:[#allocation4 + $0x30] sm:$0xff] }
 0x269   : > { %1367 = vmatpush1.msra.mxu0 %v3387_v11  ;;  %1438 = vmatpush1.msra.mxu1 %v3564_v59  ;;  %v4800_v11 = vld [vmem:[#allocation34_spill] sm:$0xff] }
 0x26a   : > { %1368 = vmatprep.subr.mxu0 %v3389_v12  ;;  %1439 = vmatprep.subr.mxu1 %v3568_v60  ;;  %v4801_v12 = vld [vmem:[#allocation24_spill] sm:$0xff] }
 0x26b   : > { %1369 = vmatpush1.msra.mxu0 %v3394_v13  ;;  %1440 = vmatpush1.msra.mxu1 %v3574_v61  ;;  %v4802_v13 = vld [vmem:[#allocation35_spill] sm:$0xff] }
 0x26c   : > { %1370 = vmatprep.subr.mxu0 %v3401_v15  ;;  %1441 = vmatprep.subr.mxu1 %v3577_v62  ;;  %v4803_v15 = vld [vmem:[#allocation25_spill] sm:$0xff] }
 0x26d   : > { %1371 = vmatpush1.msra.mxu0 %v3404_v16  ;;  %1442 = vmatpush1.msra.mxu1 %v3581_v63  ;;  %v4804_v16 = vld [vmem:[#allocation36_spill] sm:$0xff] }
 0x26e   : > { %1372 = vmatprep.subr.mxu0 %v3407_v17  ;;  %1443 = vmatprep.subr.mxu1 %v3585_v1  ;;  %v4805_v17 = vld [vmem:[#allocation26_spill] sm:$0xff] }
 0x26f   : > { %1373 = vmatpush1.msra.mxu0 %v3415_v19  ;;  %1444 = vmatpush1.msra.mxu1 %v3589_v2  ;;  %v4806_v19 = vld [vmem:[#allocation37_spill] sm:$0xff] }
 0x270   : > { %1374 = vmatprep.subr.mxu0 %v3425_v22  ;;  %1445 = vmatprep.subr.mxu1 %v3593_v3  ;;  %v4807_v22 = vld [vmem:[#allocation27_spill] sm:$0xff] }
 0x271   : > { %1375 = vmatpush1.msra.mxu0 %v3428_v23  ;;  %1446 = vmatpush1.msra.mxu1 %v3597_v4  ;;  %v4808_v23 = vld [vmem:[#allocation38_spill] sm:$0xff] }
 0x272   : > { %1376 = vmatprep.subr.mxu0 %v3431_v24  ;;  %1447 = vmatprep.subr.mxu1 %v3601_v5  ;;  %v4809_v24 = vld [vmem:[#allocation28_spill] sm:$0xff]  ;;  %4844 = vst [vmem:[#allocation38_spill] sm:$0xff] %v4265_v56 }
 0x273   : > { %1377 = vmatpush1.msra.mxu0 %v3439_v26  ;;  %1448 = vmatpush1.msra.mxu1 %v3606_v6  ;;  %v4810_v26 = vld [vmem:[#allocation39_spill] sm:$0xff] }
 0x274   : > { %1378 = vmatprep.subr.mxu0 %v3449_v29  ;;  %1449 = vmatprep.subr.mxu1 %v3610_v7  ;;  %v4811_v29 = vld [vmem:[#allocation29_spill] sm:$0xff] }
 0x275   : > { %1379 = vmatpush1.msra.mxu0 %v3452_v30  ;;  %1450 = vmatpush1.msra.mxu1 %v3614_v8  ;;  %v4812_v30 = vld [vmem:[#allocation40_spill] sm:$0xff]  ;;  %4847 = vst [vmem:[#allocation29_spill] sm:$0xff] %v4277_v34 }
 0x276   : > { %1380 = vmatprep.subr.mxu0 %v3455_v31  ;;  %1451 = vmatprep.subr.mxu1 %v3618_v9  ;;  %v4813_v31 = vld [vmem:[#allocation30_spill] sm:$0xff] }
 0x277   : > { %1381 = vmatpush1.msra.mxu0 %v4771_v41  ;;  %1452 = vmatpush1.msra.mxu1 %v3622_v14  ;;  %v4006_v41 = vld [vmem:[#allocation4 + $0x1e8] sm:$0xff] }
 0x278   : > { %1382 = vmatprep.subr.mxu0 %v4772_v54  ;;  %1453 = vmatprep.subr.mxu1 %v3626_v18  ;;  %4820 = vst [vmem:[#allocation22_spill] sm:$0xff] %v4006_v41  ;;  %v4821_v54 = vld [vmem:[#allocation33_spill] sm:$0xff] }
 0x279   : > { %1383 = vmatpush1.msra.mxu0 %v4773_v42  ;;  %1454 = vmatpush1.msra.mxu1 %v3631_v20 }
 0x27a   : > { %1384 = vmatprep.subr.mxu0 %v4774_v0  ;;  %1455 = vmatprep.subr.mxu1 %v3635_v21  ;;  %v4822_v0 = vld [vmem:[#allocation61_spill] sm:$0xff] }
 0x27b   : > { %1385 = vmatpush1.msra.mxu0 %v3487_v40  ;;  %1456 = vmatpush1.msra.mxu1 %v3639_v25  ;;  %v4814_v40 = vld [vmem:[#allocation41_spill] sm:$0xff] }
 0x27c   : > { %1386 = vmatprep.subr.mxu0 %v3497_v43  ;;  %1457 = vmatprep.subr.mxu1 %v3643_v27  ;;  %v4815_v43 = vld [vmem:[#allocation31_spill] sm:$0xff] }
 0x27d   : > { %1387 = vmatpush1.msra.mxu0 %v3500_v44  ;;  %1458 = vmatpush1.msra.mxu1 %v3647_v28  ;;  %v4816_v44 = vld [vmem:[#allocation42_spill] sm:$0xff] }
 0x27e   : > { %1388 = vmatprep.subr.mxu0 %v3503_v45  ;;  %1459 = vmatprep.subr.mxu1 %v4800_v11  ;;  %v4817_v45 = vld [vmem:[#allocation32_spill] sm:$0xff] }
 0x27f   : > { %1389 = vmatpush1.msra.mxu0 %v4801_v12  ;;  %1460 = vmatpush1.msra.mxu1 %v4802_v13 }
 0x280   : > { %1390 = vmatprep.subr.mxu0 %v4803_v15  ;;  %1461 = vmatprep.subr.mxu1 %v4804_v16 }
 0x281   : > { %1391 = vmatpush1.msra.mxu0 %v4805_v17  ;;  %1462 = vmatpush1.msra.mxu1 %v4806_v19 }
 0x282   : > { %1392 = vmatprep.subr.mxu0 %v4807_v22  ;;  %1463 = vmatprep.subr.mxu1 %v4808_v23 }
 0x283   : > { %1393 = vmatpush1.msra.mxu0 %v4809_v24  ;;  %1464 = vmatpush1.msra.mxu1 %v4810_v26 }
 0x284   : > { %1394 = vmatprep.subr.mxu0 %v4811_v29  ;;  %1465 = vmatprep.subr.mxu1 %v4812_v30 }
 0x285   : > { %1395 = vmatpush1.msra.mxu0 %v4813_v31  ;;  %1466 = vmatpush1.msra.mxu1 %v4814_v40 }
 0x286   : > { %1396 = vmatprep.subr.mxu0 %v4815_v43  ;;  %1467 = vmatprep.subr.mxu1 %v4816_v44 }
 0x287   : > { %1397 = vmatpush1.msra.mxu0 %v4817_v45  ;;  %1430 = vmatprep.mubr.f32.mxu0 %v4818_v32 }
 0x288   : > { %1468 = vmatpush1.msra.mxu1 %v4819_v39  ;;  %1501 = vmatprep.mubr.f32.mxu1 %v4818_v32 }
 0x289   : > { %1541 = vmatprep.subr.mxu0 %v4006_v41  ;;  %1612 = vmatprep.subr.mxu1 %v4821_v54 }
 0x328   : > { %v1257_v42 = vpop.f32.mrf.mxu0  ;;  %v1328_v51 = vpop.f32.mrf.mxu1 }
 0x329   : > { %v1258_v55 = vadd.f32 %v1257_v42, %v4822_v0  ;;  %v1329_v50 = vadd.f32 %v1328_v51, %v4824_v58  ;;  %v4837_v51 = vld [vmem:[#allocation64_spill] sm:$0xff] }
 0x32a   : > { %v1259_v37 = vpop.f32.mrf.mxu0  ;;  %v1330_v53 = vpop.f32.mrf.mxu1 }
 0x32b   : > { %v2643_v36 = vmul.f32 -1.442695, %v1258_v55  ;;  %v1260_v49 = vadd.f32 %v1259_v37, %v4823_v33  ;;  %v2645_v57 = vmul.f32 -1.442695, %v1329_v50  ;;  %v1331_v38 = vadd.f32 %v1330_v53, %v4825_v10  ;;  %v4022_v55 = vld [vmem:[#allocation4 + $0x1e0] sm:$0xff] }
 0x32c   : > { %v4030_v37 = vld [vmem:[#allocation4 + $0x1c0] sm:$0xff] }
 0x32d   : > { %2850 = vpow2.f32 %v2643_v36  ;;  %v2644_v35 = vmul.f32 -1.442695, %v1260_v49  ;;  %v4034_v36 = vld [vmem:[#allocation4 + $0x1a8] sm:$0xff]  ;;  %v4038_v33 = vld [vmem:[#allocation4 + $0x1a0] sm:$0xff] }
 0x32f   : > { %2852 = vpow2.f32 %v2644_v35 }
 0x330   : > { %2854 = vpow2.f32 %v2645_v57 }
 0x33a   : > { %v2851_v52 = vpop.eup %2850 }
 0x33b   : > { %v1342_v46 = vadd.f32 1.0, %v2851_v52 }
 0x33c   : > { %v2853_v47 = vpop.eup %2852 }
 0x33d   : > { %2856 = vrcp.f32 %v1342_v46  ;;  %v1343_v12 = vadd.f32 1.0, %v2853_v47  ;;  %v2855_v15 = vpop.eup %2854  ;;  %v4839_v46 = vld [vmem:[#allocation49_spill] sm:$0xff] }
 0x33e   : > { %2858 = vtanh.f32 %v1331_v38  ;;  %v1344_v29 = vadd.f32 1.0, %v2855_v15 }
 0x33f   : > { %2860 = vrcp.f32 %v1343_v12 }
 0x340   : > { %2862 = vrcp.f32 %v1344_v29 }
 0x34a   : > { %v2857_v17 = vpop.eup %2856 }
 0x34b   : > { %v2859_v22 = vpop.eup %2858  ;;  %v1352_v31 = vmul.f32 %v2857_v17, %v3935_v48  ;;  %v4026_v48 = vld [vmem:[#allocation4 + $0x1c8] sm:$0xff] }
 0x34c   : > { %v2861_v24 = vpop.eup %2860 }
 0x34d   : > { %v1353_v43 = vmul.f32 %v2861_v24, %v2859_v22  ;;  %v2863_v54 = vpop.eup %2862 }
 0x34f   : > { %v4015_v45 = vadd.f32 %v1353_v43, %v1352_v31 }
 0x351   : > { %2864 = vtanh.f32 %v4015_v45 }
 0x35e   : > { %v2865_v42 = vpop.eup %2864 }
 0x35f   : > { %v4018_v0 = vmul.f32 %v2865_v42, %v2863_v54 }
 0x361   : > { %4826 = vst [vmem:[#allocation23_spill] sm:$0xff] %v4018_v0  ;;  %1431 = vmatmul.mubr.f32.vlgmr.msra.gmra.mxu0 %v4018_v0  ;;  %1502 = vmatmul.mubr.f32.vlgmr.msra.gmra.mxu1 %v4018_v0  ;;  %v4273_v0 = vld [vmem:[#allocation4 + $0x38] sm:$0xff] }
 0x362   : > { %1542 = vmatpush1.msra.mxu0 %v4022_v55  ;;  %1613 = vmatpush1.msra.mxu1 %v3564_v59  ;;  %v4042_v59 = vld [vmem:[#allocation4 + $0x188] sm:$0xff]  ;;  %4846 = vst [vmem:[#allocation39_spill] sm:$0xff] %v4273_v0 }
 0x363   : > { %1543 = vmatprep.subr.mxu0 %v4026_v48  ;;  %1614 = vmatprep.subr.mxu1 %v3568_v60  ;;  %v4046_v60 = vld [vmem:[#allocation4 + $0x180] sm:$0xff] }
 0x364   : > { %1544 = vmatpush1.msra.mxu0 %v4030_v37  ;;  %1615 = vmatpush1.msra.mxu1 %v3574_v61  ;;  %v4050_v61 = vld [vmem:[#allocation4 + $0x168] sm:$0xff] }
 0x365   : > { %1545 = vmatprep.subr.mxu0 %v4034_v36  ;;  %1616 = vmatprep.subr.mxu1 %v3577_v62  ;;  %v4054_v62 = vld [vmem:[#allocation4 + $0x160] sm:$0xff] }
 0x366   : > { %1546 = vmatpush1.msra.mxu0 %v4038_v33  ;;  %1617 = vmatpush1.msra.mxu1 %v3581_v63  ;;  %v4058_v63 = vld [vmem:[#allocation4 + $0x148] sm:$0xff] }
 0x367   : > { %1547 = vmatprep.subr.mxu0 %v4042_v59  ;;  %1618 = vmatprep.subr.mxu1 %v3585_v1  ;;  %v4062_v1 = vld [vmem:[#allocation4 + $0x140] sm:$0xff] }
 0x368   : > { %1548 = vmatpush1.msra.mxu0 %v4046_v60  ;;  %1619 = vmatpush1.msra.mxu1 %v3589_v2  ;;  %v4066_v2 = vld [vmem:[#allocation4 + $0x128] sm:$0xff] }
 0x369   : > { %1549 = vmatprep.subr.mxu0 %v4050_v61  ;;  %1620 = vmatprep.subr.mxu1 %v3593_v3  ;;  %v4070_v3 = vld [vmem:[#allocation4 + $0x120] sm:$0xff] }
 0x36a   : > { %1550 = vmatpush1.msra.mxu0 %v4054_v62  ;;  %1621 = vmatpush1.msra.mxu1 %v3597_v4  ;;  %v4074_v4 = vld [vmem:[#allocation4 + $0x108] sm:$0xff] }
 0x36b   : > { %1551 = vmatprep.subr.mxu0 %v4058_v63  ;;  %1622 = vmatprep.subr.mxu1 %v3601_v5  ;;  %v4078_v5 = vld [vmem:[#allocation4 + $0x100] sm:$0xff] }
 0x36c   : > { %1552 = vmatpush1.msra.mxu0 %v4062_v1  ;;  %1623 = vmatpush1.msra.mxu1 %v3606_v6  ;;  %v4082_v6 = vld [vmem:[#allocation4 + $0xe8] sm:$0xff] }
 0x36d   : > { %1553 = vmatprep.subr.mxu0 %v4066_v2  ;;  %1624 = vmatprep.subr.mxu1 %v3610_v7  ;;  %v4086_v7 = vld [vmem:[#allocation4 + $0xe0] sm:$0xff] }
 0x36e   : > { %1554 = vmatpush1.msra.mxu0 %v4070_v3  ;;  %1625 = vmatpush1.msra.mxu1 %v3614_v8  ;;  %v4090_v8 = vld [vmem:[#allocation4 + $0xc8] sm:$0xff] }
 0x36f   : > { %1555 = vmatprep.subr.mxu0 %v4074_v4  ;;  %1626 = vmatprep.subr.mxu1 %v3618_v9  ;;  %v4094_v9 = vld [vmem:[#allocation4 + $0xc0] sm:$0xff] }
 0x370   : > { %1556 = vmatpush1.msra.mxu0 %v4078_v5  ;;  %1627 = vmatpush1.msra.mxu1 %v3622_v14  ;;  %v4098_v14 = vld [vmem:[#allocation4 + $0xa8] sm:$0xff] }
 0x371   : > { %1557 = vmatprep.subr.mxu0 %v4082_v6  ;;  %1628 = vmatprep.subr.mxu1 %v3626_v18  ;;  %v4102_v18 = vld [vmem:[#allocation4 + $0xa0] sm:$0xff] }
 0x372   : > { %1558 = vmatpush1.msra.mxu0 %v4086_v7  ;;  %1629 = vmatpush1.msra.mxu1 %v3631_v20  ;;  %v4106_v20 = vld [vmem:[#allocation4 + $0x88] sm:$0xff] }
 0x373   : > { %1559 = vmatprep.subr.mxu0 %v4090_v8  ;;  %1630 = vmatprep.subr.mxu1 %v3635_v21  ;;  %v4110_v21 = vld [vmem:[#allocation4 + $0x80] sm:$0xff] }
 0x374   : > { %1560 = vmatpush1.msra.mxu0 %v4094_v9  ;;  %1631 = vmatpush1.msra.mxu1 %v3639_v25  ;;  %v4114_v25 = vld [vmem:[#allocation4 + $0x68] sm:$0xff] }
 0x375   : > { %1561 = vmatprep.subr.mxu0 %v4098_v14  ;;  %1632 = vmatprep.subr.mxu1 %v3643_v27  ;;  %4827 = vst [vmem:[#allocation19_spill] sm:$0xff] %v4114_v25  ;;  %v4118_v27 = vld [vmem:[#allocation4 + $0x60] sm:$0xff] }
 0x376   : > { %1562 = vmatpush1.msra.mxu0 %v4102_v18  ;;  %1633 = vmatpush1.msra.mxu1 %v3647_v28  ;;  %4828 = vst [vmem:[#allocation58_spill] sm:$0xff] %v4118_v27  ;;  %v4122_v28 = vld [vmem:[#allocation4 + $0x48] sm:$0xff] }
 0x377   : > { %1563 = vmatprep.subr.mxu0 %v4106_v20  ;;  %1634 = vmatprep.subr.mxu1 %v4800_v11  ;;  %4829 = vst [vmem:[#allocation60_spill] sm:$0xff] %v4122_v28  ;;  %v4126_v11 = vld [vmem:[#allocation4 + $0x40] sm:$0xff] }
 0x378   : > { %1564 = vmatpush1.msra.mxu0 %v4110_v21  ;;  %1635 = vmatpush1.msra.mxu1 %v4802_v13  ;;  %4830 = vst [vmem:[#allocation44_spill] sm:$0xff] %v4126_v11  ;;  %v4130_v13 = vld [vmem:[#allocation4 + $0x28] sm:$0xff] }
 0x379   : > { %1565 = vmatprep.subr.mxu0 %v4114_v25  ;;  %1636 = vmatprep.subr.mxu1 %v4804_v16  ;;  %4831 = vst [vmem:[#allocation45_spill] sm:$0xff] %v4130_v13  ;;  %v4134_v16 = vld [vmem:[#allocation4 + $0x20] sm:$0xff] }
 0x37a   : > { %1566 = vmatpush1.msra.mxu0 %v4118_v27  ;;  %1637 = vmatpush1.msra.mxu1 %v4806_v19  ;;  %4832 = vst [vmem:[#allocation34_spill] sm:$0xff] %v4134_v16  ;;  %v4138_v19 = vld [vmem:[#allocation4 + $0x8] sm:$0xff] }
 0x37b   : > { %1567 = vmatprep.subr.mxu0 %v4122_v28  ;;  %1638 = vmatprep.subr.mxu1 %v4808_v23  ;;  %4833 = vst [vmem:[#allocation24_spill] sm:$0xff] %v4138_v19  ;;  %v4142_v23 = vld [vmem:[#allocation4] sm:$0xff] }
 0x37c   : > { %1568 = vmatpush1.msra.mxu0 %v4126_v11  ;;  %1639 = vmatpush1.msra.mxu1 %v4810_v26  ;;  %4834 = vst [vmem:[#allocation35_spill] sm:$0xff] %v4142_v23  ;;  %v4149_v26 = vld [vmem:[#allocation4 + $0x1f8] sm:$0xff] }
 0x37d   : > { %1569 = vmatprep.subr.mxu0 %v4130_v13  ;;  %1640 = vmatprep.subr.mxu1 %v4812_v30  ;;  %4835 = vst [vmem:[#allocation25_spill] sm:$0xff] %v4149_v26 }
 0x37e   : > { %1570 = vmatpush1.msra.mxu0 %v4134_v16  ;;  %1641 = vmatpush1.msra.mxu1 %v4814_v40  ;;  %v4836_v40 = vld [vmem:[#allocation63_spill] sm:$0xff] }
 0x37f   : > { %1571 = vmatprep.subr.mxu0 %v4138_v19  ;;  %1642 = vmatprep.subr.mxu1 %v4816_v44 }
 0x380   : > { %1572 = vmatpush1.msra.mxu0 %v4142_v23  ;;  %1605 = vmatprep.mubr.f32.mxu0 %v4818_v32 }
 0x381   : > { %1643 = vmatpush1.msra.mxu1 %v4819_v39  ;;  %1676 = vmatprep.mubr.f32.mxu1 %v4818_v32  ;;  %v4838_v39 = vld [vmem:[#allocation48_spill] sm:$0xff] }
 0x382   : > { %1716 = vmatprep.subr.mxu0 %v4006_v41  ;;  %1787 = vmatprep.subr.mxu1 %v4149_v26 }
 0x421   : > { %v1432_v30 = vpop.f32.mrf.mxu0  ;;  %v1503_v53 = vpop.f32.mrf.mxu1 }
 0x422   : > { %v1433_v49 = vadd.f32 %v1432_v30, %v4836_v40  ;;  %v1504_v57 = vadd.f32 %v1503_v53, %v4838_v39  ;;  %v4185_v53 = vld [vmem:[#allocation4 + $0x198] sm:$0xff]  ;;  %v4189_v39 = vld [vmem:[#allocation4 + $0x190] sm:$0xff] }
 0x423   : > { %v1434_v44 = vpop.f32.mrf.mxu0  ;;  %v1505_v52 = vpop.f32.mrf.mxu1 }
 0x424   : > { %v2646_v35 = vmul.f32 -1.442695, %v1433_v49  ;;  %v1435_v58 = vadd.f32 %v1434_v44, %v4837_v51  ;;  %v2648_v10 = vmul.f32 -1.442695, %v1504_v57  ;;  %v1506_v47 = vadd.f32 %v1505_v52, %v4839_v46  ;;  %v4173_v51 = vld [vmem:[#allocation4 + $0x1d0] sm:$0xff]  ;;  %v4193_v57 = vld [vmem:[#allocation4 + $0x178] sm:$0xff] }
 0x425   : > { %v4197_v52 = vld [vmem:[#allocation4 + $0x170] sm:$0xff]  ;;  %v4209_v46 = vld [vmem:[#allocation4 + $0x138] sm:$0xff] }
 0x426   : > { %2866 = vpow2.f32 %v2646_v35  ;;  %v2647_v50 = vmul.f32 -1.442695, %v1435_v58  ;;  %v4165_v35 = vld [vmem:[#allocation4 + $0x1f0] sm:$0xff]  ;;  %v4177_v58 = vld [vmem:[#allocation4 + $0x1b8] sm:$0xff] }
 0x428   : > { %2868 = vpow2.f32 %v2647_v50  ;;  %v4181_v50 = vld [vmem:[#allocation4 + $0x1b0] sm:$0xff] }
 0x429   : > { %2870 = vpow2.f32 %v2648_v10  ;;  %v4201_v10 = vld [vmem:[#allocation4 + $0x158] sm:$0xff] }
 0x433   : > { %v2867_v38 = vpop.eup %2866 }
 0x434   : > { %v1517_v12 = vadd.f32 1.0, %v2867_v38  ;;  %v4205_v38 = vld [vmem:[#allocation4 + $0x150] sm:$0xff] }
 0x435   : > { %v2869_v15 = vpop.eup %2868 }
 0x436   : > { %2872 = vrcp.f32 %v1517_v12  ;;  %v1518_v17 = vadd.f32 1.0, %v2869_v15  ;;  %v2871_v22 = vpop.eup %2870  ;;  %v4217_v12 = vld [vmem:[#allocation4 + $0x118] sm:$0xff]  ;;  %v4221_v15 = vld [vmem:[#allocation4 + $0x110] sm:$0xff] }
 0x437   : > { %2874 = vtanh.f32 %v1506_v47  ;;  %v1519_v43 = vadd.f32 1.0, %v2871_v22  ;;  %v4213_v47 = vld [vmem:[#allocation4 + $0x130] sm:$0xff] }
 0x438   : > { %2876 = vrcp.f32 %v1518_v17  ;;  %v4225_v17 = vld [vmem:[#allocation4 + $0xf8] sm:$0xff]  ;;  %v4229_v22 = vld [vmem:[#allocation4 + $0xf0] sm:$0xff] }
 0x439   : > { %2878 = vrcp.f32 %v1519_v43  ;;  %v4245_v43 = vld [vmem:[#allocation4 + $0xb0] sm:$0xff] }
 0x443   : > { %v2873_v24 = vpop.eup %2872 }
 0x444   : > { %v2875_v29 = vpop.eup %2874  ;;  %v1527_v54 = vmul.f32 %v2873_v24, %v4015_v45  ;;  %v4169_v45 = vld [vmem:[#allocation4 + $0x1d8] sm:$0xff] }
 0x445   : > { %v2877_v31 = vpop.eup %2876  ;;  %v4233_v24 = vld [vmem:[#allocation4 + $0xd8] sm:$0xff] }
 0x446   : > { %v1528_v42 = vmul.f32 %v2877_v31, %v2875_v29  ;;  %v2879_v40 = vpop.eup %2878  ;;  %v4237_v29 = vld [vmem:[#allocation4 + $0xd0] sm:$0xff]  ;;  %v4241_v31 = vld [vmem:[#allocation4 + $0xb8] sm:$0xff] }
 0x448   : > { %v4157_v30 = vadd.f32 %v1528_v42, %v1527_v54  ;;  %v4249_v54 = vld [vmem:[#allocation4 + $0x98] sm:$0xff]  ;;  %v4253_v42 = vld [vmem:[#allocation4 + $0x90] sm:$0xff] }
 0x449   : > { %4841 = vst [vmem:[#allocation26_spill] sm:$0xff] %v4253_v42 }
 0x44a   : > { %2880 = vtanh.f32 %v4157_v30 }
 0x457   : > { %v2881_v49 = vpop.eup %2880 }
 0x458   : > { %v4160_v44 = vmul.f32 %v2881_v49, %v2879_v40  ;;  %v4257_v40 = vld [vmem:[#allocation4 + $0x78] sm:$0xff]  ;;  %v4261_v49 = vld [vmem:[#allocation4 + $0x70] sm:$0xff] }
 0x459   : > { %4842 = vst [vmem:[#allocation37_spill] sm:$0xff] %v4257_v40  ;;  %4843 = vst [vmem:[#allocation27_spill] sm:$0xff] %v4261_v49 }
 0x45a   : > { %4840 = vst [vmem:[#allocation36_spill] sm:$0xff] %v4160_v44  ;;  %1606 = vmatmul.mubr.f32.vlgmr.msra.gmra.mxu0 %v4160_v44  ;;  %1677 = vmatmul.mubr.f32.vlgmr.msra.gmra.mxu1 %v4160_v44  ;;  %v4269_v44 = vld [vmem:[#allocation4 + $0x50] sm:$0xff] }
 0x45b   : > { %1717 = vmatpush1.msra.mxu0 %v4022_v55  ;;  %1788 = vmatpush1.msra.mxu1 %v4165_v35  ;;  %4845 = vst [vmem:[#allocation28_spill] sm:$0xff] %v4269_v44 }
 0x45c   : > { %1718 = vmatprep.subr.mxu0 %v4026_v48  ;;  %1789 = vmatprep.subr.mxu1 %v4169_v45 }
 0x45d   : > { %1719 = vmatpush1.msra.mxu0 %v4030_v37  ;;  %1790 = vmatpush1.msra.mxu1 %v4173_v51 }
 0x45e   : > { %1720 = vmatprep.subr.mxu0 %v4034_v36  ;;  %1791 = vmatprep.subr.mxu1 %v4177_v58 }
 0x45f   : > { %1721 = vmatpush1.msra.mxu0 %v4038_v33  ;;  %1792 = vmatpush1.msra.mxu1 %v4181_v50 }
 0x460   : > { %1722 = vmatprep.subr.mxu0 %v4042_v59  ;;  %1793 = vmatprep.subr.mxu1 %v4185_v53 }
 0x461   : > { %1723 = vmatpush1.msra.mxu0 %v4046_v60  ;;  %1794 = vmatpush1.msra.mxu1 %v4189_v39 }
 0x462   : > { %1724 = vmatprep.subr.mxu0 %v4050_v61  ;;  %1795 = vmatprep.subr.mxu1 %v4193_v57 }
 0x463   : > { %1725 = vmatpush1.msra.mxu0 %v4054_v62  ;;  %1796 = vmatpush1.msra.mxu1 %v4197_v52 }
 0x464   : > { %1726 = vmatprep.subr.mxu0 %v4058_v63  ;;  %1797 = vmatprep.subr.mxu1 %v4201_v10 }
 0x465   : > { %1727 = vmatpush1.msra.mxu0 %v4062_v1  ;;  %1798 = vmatpush1.msra.mxu1 %v4205_v38 }
 0x466   : > { %1728 = vmatprep.subr.mxu0 %v4066_v2  ;;  %1799 = vmatprep.subr.mxu1 %v4209_v46 }
 0x467   : > { %1729 = vmatpush1.msra.mxu0 %v4070_v3  ;;  %1800 = vmatpush1.msra.mxu1 %v4213_v47 }
 0x468   : > { %1730 = vmatprep.subr.mxu0 %v4074_v4  ;;  %1801 = vmatprep.subr.mxu1 %v4217_v12 }
 0x469   : > { %1731 = vmatpush1.msra.mxu0 %v4078_v5  ;;  %1802 = vmatpush1.msra.mxu1 %v4221_v15 }
 0x46a   : > { %1732 = vmatprep.subr.mxu0 %v4082_v6  ;;  %1803 = vmatprep.subr.mxu1 %v4225_v17 }
 0x46b   : > { %1733 = vmatpush1.msra.mxu0 %v4086_v7  ;;  %1804 = vmatpush1.msra.mxu1 %v4229_v22 }
 0x46c   : > { %1734 = vmatprep.subr.mxu0 %v4090_v8  ;;  %1805 = vmatprep.subr.mxu1 %v4233_v24 }
 0x46d   : > { %1735 = vmatpush1.msra.mxu0 %v4094_v9  ;;  %1806 = vmatpush1.msra.mxu1 %v4237_v29 }
 0x46e   : > { %1736 = vmatprep.subr.mxu0 %v4098_v14  ;;  %1807 = vmatprep.subr.mxu1 %v4241_v31 }
 0x46f   : > { %1737 = vmatpush1.msra.mxu0 %v4102_v18  ;;  %1808 = vmatpush1.msra.mxu1 %v4245_v43 }
 0x470   : > { %1738 = vmatprep.subr.mxu0 %v4106_v20  ;;  %1809 = vmatprep.subr.mxu1 %v4249_v54 }
 0x471   : > { %1739 = vmatpush1.msra.mxu0 %v4110_v21  ;;  %1810 = vmatpush1.msra.mxu1 %v4253_v42 }
 0x472   : > { %1740 = vmatprep.subr.mxu0 %v4114_v25  ;;  %1811 = vmatprep.subr.mxu1 %v4257_v40  ;;  %v4853_v25 = vld [vmem:[#allocation51_spill] sm:$0xff] }
 0x473   : > { %1741 = vmatpush1.msra.mxu0 %v4118_v27  ;;  %1812 = vmatpush1.msra.mxu1 %v4261_v49  ;;  %v4852_v49 = vld [vmem:[#allocation50_spill] sm:$0xff] }
 0x474   : > { %1742 = vmatprep.subr.mxu0 %v4122_v28  ;;  %1813 = vmatprep.subr.mxu1 %v4265_v56  ;;  %v4281_v56 = vld [vmem:[#allocation4 + $0x18] sm:$0xff] }
 0x475   : > { %1743 = vmatpush1.msra.mxu0 %v4126_v11  ;;  %1814 = vmatpush1.msra.mxu1 %v4269_v44  ;;  %4848 = vst [vmem:[#allocation40_spill] sm:$0xff] %v4281_v56 }
 0x476   : > { %1744 = vmatprep.subr.mxu0 %v4130_v13  ;;  %1815 = vmatprep.subr.mxu1 %v4273_v0  ;;  %v4286_v13 = vld [vmem:[#allocation4 + $0x10] sm:$0xff] }
 0x477   : > { %1745 = vmatpush1.msra.mxu0 %v4134_v16  ;;  %1816 = vmatpush1.msra.mxu1 %v4277_v34  ;;  %4849 = vst [vmem:[#allocation30_spill] sm:$0xff] %v4286_v13 }
 0x478   : > { %1746 = vmatprep.subr.mxu0 %v4138_v19  ;;  %1817 = vmatprep.subr.mxu1 %v4281_v56  ;;  %v4850_v19 = vld [vmem:[#allocation65_spill] sm:$0xff]  ;;  %v4851_v56 = vld [vmem:[#allocation66_spill] sm:$0xff] }
 0x479   : > { %1747 = vmatpush1.msra.mxu0 %v4142_v23  ;;  %1780 = vmatprep.mubr.f32.mxu0 %v4818_v32 }
 0x47a   : > { %1818 = vmatpush1.msra.mxu1 %v4286_v13  ;;  %1851 = vmatprep.mubr.f32.mxu1 %v4818_v32 }
 0x47b   : > { %1891 = vmatprep.subr.mxu0 %v4006_v41  ;;  %1962 = vmatprep.subr.mxu1 %v4149_v26 }
 0x51a   : > { %v1607_v34 = vpop.f32.mrf.mxu0  ;;  %v1678_v28 = vpop.f32.mrf.mxu1 }
 0x51b   : > { %v1608_v16 = vadd.f32 %v1607_v34, %v4850_v19  ;;  %v1679_v27 = vadd.f32 %v1678_v28, %v4852_v49  ;;  %v4861_v49 = vld [vmem:[#allocation38_spill] sm:$0xff] }
 0x51c   : > { %v1609_v0 = vpop.f32.mrf.mxu0  ;;  %v1680_v13 = vpop.f32.mrf.mxu1 }
 0x51d   : > { %v2649_v44 = vmul.f32 -1.442695, %v1608_v16  ;;  %v1610_v11 = vadd.f32 %v1609_v0, %v4851_v56  ;;  %v2651_v40 = vmul.f32 -1.442695, %v1679_v27  ;;  %v1681_v41 = vadd.f32 %v1680_v13, %v4853_v25  ;;  %v4856_v13 = vld [vmem:[#allocation19_spill] sm:$0xff] }
 0x51f   : > { %2882 = vpow2.f32 %v2649_v44  ;;  %v2650_v23 = vmul.f32 -1.442695, %v1610_v11 }
 0x521   : > { %2884 = vpow2.f32 %v2650_v23 }
 0x522   : > { %2886 = vpow2.f32 %v2651_v40  ;;  %v4860_v40 = vld [vmem:[#allocation60_spill] sm:$0xff] }
 0x52c   : > { %v2883_v32 = vpop.eup %2882 }
 0x52d   : > { %v1692_v42 = vadd.f32 1.0, %v2883_v32 }
 0x52e   : > { %v2885_v26 = vpop.eup %2884 }
 0x52f   : > { %2888 = vrcp.f32 %v1692_v42  ;;  %v1693_v34 = vadd.f32 1.0, %v2885_v26  ;;  %v2887_v16 = vpop.eup %2886  ;;  %v4857_v26 = vld [vmem:[#allocation37_spill] sm:$0xff]  ;;  %v4859_v42 = vld [vmem:[#allocation27_spill] sm:$0xff] }
 0x530   : > { %2890 = vtanh.f32 %v1681_v41  ;;  %v1694_v19 = vadd.f32 1.0, %v2887_v16  ;;  %v4855_v41 = vld [vmem:[#allocation26_spill] sm:$0xff]  ;;  %v4863_v16 = vld [vmem:[#allocation28_spill] sm:$0xff] }
 0x531   : > { %2892 = vrcp.f32 %v1693_v34  ;;  %v4862_v34 = vld [vmem:[#allocation44_spill] sm:$0xff] }
 0x532   : > { %2894 = vrcp.f32 %v1694_v19  ;;  %v4867_v19 = vld [vmem:[#allocation29_spill] sm:$0xff] }
 0x53c   : > { %v2889_v56 = vpop.eup %2888 }
 0x53d   : > { %v2891_v0 = vpop.eup %2890  ;;  %v1702_v23 = vmul.f32 %v2889_v56, %v4157_v30  ;;  %v4858_v30 = vld [vmem:[#allocation58_spill] sm:$0xff]  ;;  %v4864_v56 = vld [vmem:[#allocation45_spill] sm:$0xff] }
 0x53e   : > { %v2893_v11 = vpop.eup %2892 }
 0x53f   : > { %v1703_v28 = vmul.f32 %v2893_v11, %v2891_v0  ;;  %v2895_v32 = vpop.eup %2894  ;;  %v4865_v0 = vld [vmem:[#allocation39_spill] sm:$0xff]  ;;  %v4866_v11 = vld [vmem:[#allocation34_spill] sm:$0xff] }
 0x541   : > { %v4297_v44 = vadd.f32 %v1703_v28, %v1702_v23  ;;  %v4868_v23 = vld [vmem:[#allocation24_spill] sm:$0xff] }
 0x542   : > { %v4869_v28 = vld [vmem:[#allocation40_spill] sm:$0xff] }
 0x543   : > { %2896 = vtanh.f32 %v4297_v44 }
 0x550   : > { %v2897_v25 = vpop.eup %2896 }
 0x551   : > { %v4300_v27 = vmul.f32 %v2897_v25, %v2895_v32  ;;  %v4870_v32 = vld [vmem:[#allocation35_spill] sm:$0xff]  ;;  %v4871_v25 = vmov 0.0  }
 0x553   : > { %4854 = vst [vmem:[#allocation41_spill] sm:$0xff] %v4300_v27  ;;  %1781 = vmatmul.mubr.f32.vlgmr.msra.gmra.mxu0 %v4300_v27  ;;  %1852 = vmatmul.mubr.f32.vlgmr.msra.gmra.mxu1 %v4300_v27  ;;  %v4872_v27 = vld [vmem:[#allocation30_spill] sm:$0xff] }
 0x554   : > { %1892 = vmatpush1.msra.mxu0 %v4022_v55  ;;  %1963 = vmatpush1.msra.mxu1 %v4165_v35 }
 0x555   : > { %1893 = vmatprep.subr.mxu0 %v4026_v48  ;;  %1964 = vmatprep.subr.mxu1 %v4169_v45 }
 0x556   : > { %1894 = vmatpush1.msra.mxu0 %v4030_v37  ;;  %1965 = vmatpush1.msra.mxu1 %v4173_v51 }
 0x557   : > { %1895 = vmatprep.subr.mxu0 %v4034_v36  ;;  %1966 = vmatprep.subr.mxu1 %v4177_v58 }
 0x558   : > { %1896 = vmatpush1.msra.mxu0 %v4038_v33  ;;  %1967 = vmatpush1.msra.mxu1 %v4181_v50 }
 0x559   : > { %1897 = vmatprep.subr.mxu0 %v4042_v59  ;;  %1968 = vmatprep.subr.mxu1 %v4185_v53 }
 0x55a   : > { %1898 = vmatpush1.msra.mxu0 %v4046_v60  ;;  %1969 = vmatpush1.msra.mxu1 %v4189_v39 }
 0x55b   : > { %1899 = vmatprep.subr.mxu0 %v4050_v61  ;;  %1970 = vmatprep.subr.mxu1 %v4193_v57 }
 0x55c   : > { %1900 = vmatpush1.msra.mxu0 %v4054_v62  ;;  %1971 = vmatpush1.msra.mxu1 %v4197_v52 }
 0x55d   : > { %1901 = vmatprep.subr.mxu0 %v4058_v63  ;;  %1972 = vmatprep.subr.mxu1 %v4201_v10 }
 0x55e   : > { %1902 = vmatpush1.msra.mxu0 %v4062_v1  ;;  %1973 = vmatpush1.msra.mxu1 %v4205_v38 }
 0x55f   : > { %1903 = vmatprep.subr.mxu0 %v4066_v2  ;;  %1974 = vmatprep.subr.mxu1 %v4209_v46 }
 0x560   : > { %1904 = vmatpush1.msra.mxu0 %v4070_v3  ;;  %1975 = vmatpush1.msra.mxu1 %v4213_v47 }
 0x561   : > { %1905 = vmatprep.subr.mxu0 %v4074_v4  ;;  %1976 = vmatprep.subr.mxu1 %v4217_v12 }
 0x562   : > { %1906 = vmatpush1.msra.mxu0 %v4078_v5  ;;  %1977 = vmatpush1.msra.mxu1 %v4221_v15 }
 0x563   : > { %1907 = vmatprep.subr.mxu0 %v4082_v6  ;;  %1978 = vmatprep.subr.mxu1 %v4225_v17 }
 0x564   : > { %1908 = vmatpush1.msra.mxu0 %v4086_v7  ;;  %1979 = vmatpush1.msra.mxu1 %v4229_v22 }
 0x565   : > { %1909 = vmatprep.subr.mxu0 %v4090_v8  ;;  %1980 = vmatprep.subr.mxu1 %v4233_v24 }
 0x566   : > { %1910 = vmatpush1.msra.mxu0 %v4094_v9  ;;  %1981 = vmatpush1.msra.mxu1 %v4237_v29 }
 0x567   : > { %1911 = vmatprep.subr.mxu0 %v4098_v14  ;;  %1982 = vmatprep.subr.mxu1 %v4241_v31 }
 0x568   : > { %1912 = vmatpush1.msra.mxu0 %v4102_v18  ;;  %1983 = vmatpush1.msra.mxu1 %v4245_v43 }
 0x569   : > { %1913 = vmatprep.subr.mxu0 %v4106_v20  ;;  %1984 = vmatprep.subr.mxu1 %v4249_v54 }
 0x56a   : > { %1914 = vmatpush1.msra.mxu0 %v4110_v21  ;;  %1985 = vmatpush1.msra.mxu1 %v4855_v41 }
 0x56b   : > { %1915 = vmatprep.subr.mxu0 %v4856_v13  ;;  %1986 = vmatprep.subr.mxu1 %v4857_v26  ;;  %v4878_v13 = vld [vmem:[#allocation53_spill] sm:$0xff] }
 0x56c   : > { %1916 = vmatpush1.msra.mxu0 %v4858_v30  ;;  %1987 = vmatpush1.msra.mxu1 %v4859_v42  ;;  %v4877_v42 = vld [vmem:[#allocation52_spill] sm:$0xff] }
 0x56d   : > { %1917 = vmatprep.subr.mxu0 %v4860_v40  ;;  %1988 = vmatprep.subr.mxu1 %v4861_v49 }
 0x56e   : > { %1918 = vmatpush1.msra.mxu0 %v4862_v34  ;;  %1989 = vmatpush1.msra.mxu1 %v4863_v16  ;;  %v4873_v16 = vld [vmem:[#allocation22_spill] sm:$0xff] }
 0x56f   : > { %1919 = vmatprep.subr.mxu0 %v4864_v56  ;;  %1990 = vmatprep.subr.mxu1 %v4865_v0  ;;  %v4874_v56 = vld [vmem:[#allocation25_spill] sm:$0xff] }
 0x570   : > { %1920 = vmatpush1.msra.mxu0 %v4866_v11  ;;  %1991 = vmatpush1.msra.mxu1 %v4867_v19  ;;  %v4875_v11 = vld [vmem:[#allocation67_spill] sm:$0xff] }
 0x571   : > { %1921 = vmatprep.subr.mxu0 %v4868_v23  ;;  %1992 = vmatprep.subr.mxu1 %v4869_v28  ;;  %v4876_v23 = vld [vmem:[#allocation68_spill] sm:$0xff] }
 0x572   : > { %1922 = vmatpush1.msra.mxu0 %v4870_v32  ;;  %1955 = vmatprep.mubr.f32.mxu0 %v4871_v25 }
 0x573   : > { %1993 = vmatpush1.msra.mxu1 %v4872_v27  ;;  %2026 = vmatprep.mubr.f32.mxu1 %v4871_v25 }
 0x574   : > { %2066 = vmatprep.subr.mxu0 %v4873_v16  ;;  %2137 = vmatprep.subr.mxu1 %v4874_v56 }
 0x613   : > { %v1782_v0 = vpop.f32.mrf.mxu0  ;;  %v1853_v32 = vpop.f32.mrf.mxu1 }
 0x614   : > { %v1783_v34 = vadd.f32 %v1782_v0, %v4875_v11  ;;  %v1854_v30 = vadd.f32 %v1853_v32, %v4877_v42 }
 0x615   : > { %v1784_v19 = vpop.f32.mrf.mxu0  ;;  %v1855_v27 = vpop.f32.mrf.mxu1 }
 0x616   : > { %v2652_v49 = vmul.f32 -1.442695, %v1783_v34  ;;  %v1785_v40 = vadd.f32 %v1784_v19, %v4876_v23  ;;  %v2654_v26 = vmul.f32 -1.442695, %v1854_v30  ;;  %v1856_v16 = vadd.f32 %v1855_v27, %v4878_v13 }
 0x618   : > { %2898 = vpow2.f32 %v2652_v49  ;;  %v2653_v28 = vmul.f32 -1.442695, %v1785_v40 }
 0x61a   : > { %2900 = vpow2.f32 %v2653_v28 }
 0x61b   : > { %2902 = vpow2.f32 %v2654_v26 }
 0x625   : > { %v2899_v25 = vpop.eup %2898 }
 0x626   : > { %v1867_v41 = vadd.f32 1.0, %v2899_v25  ;;  %v2256_v25 = vld [vmem:[#allocation7 + $0x70] sm:$0xff] }
 0x627   : > { %v2901_v56 = vpop.eup %2900 }
 0x628   : > { %2904 = vrcp.f32 %v1867_v41  ;;  %v1868_v0 = vadd.f32 1.0, %v2901_v56  ;;  %v2903_v34 = vpop.eup %2902  ;;  %v2255_v56 = vld [vmem:[#allocation7 + $0x68] sm:$0xff] }
 0x629   : > { %2906 = vtanh.f32 %v1856_v16  ;;  %v1869_v19 = vadd.f32 1.0, %v2903_v34  ;;  %v4901_v16 = vld [vmem:[#allocation72_spill] sm:$0xff]  ;;  %v2253_v34 = vld [vmem:[#allocation7 + $0x58] sm:$0xff] }
 0x62a   : > { %2908 = vrcp.f32 %v1868_v0  ;;  %v2254_v0 = vld [vmem:[#allocation7 + $0x60] sm:$0xff] }
 0x62b   : > { %2910 = vrcp.f32 %v1869_v19  ;;  %v2249_v19 = vld [vmem:[#allocation7 + $0x38] sm:$0xff] }
 0x635   : > { %v2905_v11 = vpop.eup %2904 }
 0x636   : > { %v2907_v49 = vpop.eup %2906  ;;  %v1877_v23 = vmul.f32 %v2905_v11, %v4297_v44  ;;  %v2252_v11 = vld [vmem:[#allocation7 + $0x50] sm:$0xff] }
 0x637   : > { %v2909_v40 = vpop.eup %2908 }
 0x638   : > { %v1878_v42 = vmul.f32 %v2909_v40, %v2907_v49  ;;  %v2911_v27 = vpop.eup %2910  ;;  %v2251_v49 = vld [vmem:[#allocation7 + $0x48] sm:$0xff]  ;;  %v2250_v40 = vld [vmem:[#allocation7 + $0x40] sm:$0xff] }
 0x63a   : > { %v4375_v28 = vadd.f32 %v1878_v42, %v1877_v23  ;;  %v2248_v23 = vld [vmem:[#allocation7 + $0x30] sm:$0xff]  ;;  %v2247_v42 = vld [vmem:[#allocation7 + $0x28] sm:$0xff] }
 0x63c   : > { %2912 = vtanh.f32 %v4375_v28 }
 0x649   : > { %v2913_v13 = vpop.eup %2912 }
 0x64a   : > { %v4378_v26 = vmul.f32 %v2913_v13, %v2911_v27  ;;  %v2245_v27 = vld [vmem:[#allocation7 + $0x18] sm:$0xff]  ;;  %v2244_v13 = vld [vmem:[#allocation7 + $0x10] sm:$0xff] }
 0x64c   : > { %1956 = vmatmul.mubr.f32.vlgmr.msra.gmra.mxu0 %v4378_v26  ;;  %2027 = vmatmul.mubr.f32.vlgmr.msra.gmra.mxu1 %v4378_v26 }
 0x64d   : > { %2067 = vmatpush1.msra.mxu0 %v4022_v55  ;;  %2138 = vmatpush1.msra.mxu1 %v4165_v35  ;;  %v4879_v55 = vld [vmem:[#allocation26_spill] sm:$0xff] }
 0x64e   : > { %2068 = vmatprep.subr.mxu0 %v4026_v48  ;;  %2139 = vmatprep.subr.mxu1 %v4169_v45  ;;  %v4880_v48 = vld [vmem:[#allocation19_spill] sm:$0xff]  ;;  %v4898_v45 = vld [vmem:[#allocation70_spill] sm:$0xff] }
 0x64f   : > { %2069 = vmatpush1.msra.mxu0 %v4030_v37  ;;  %2140 = vmatpush1.msra.mxu1 %v4173_v51  ;;  %v4881_v37 = vld [vmem:[#allocation37_spill] sm:$0xff] }
 0x650   : > { %2070 = vmatprep.subr.mxu0 %v4034_v36  ;;  %2141 = vmatprep.subr.mxu1 %v4177_v58  ;;  %v4882_v36 = vld [vmem:[#allocation58_spill] sm:$0xff] }
 0x651   : > { %2071 = vmatpush1.msra.mxu0 %v4038_v33  ;;  %2142 = vmatpush1.msra.mxu1 %v4181_v50  ;;  %v4883_v33 = vld [vmem:[#allocation27_spill] sm:$0xff] }
 0x652   : > { %2072 = vmatprep.subr.mxu0 %v4042_v59  ;;  %2143 = vmatprep.subr.mxu1 %v4185_v53  ;;  %v4884_v59 = vld [vmem:[#allocation60_spill] sm:$0xff]  ;;  %v4899_v53 = vld [vmem:[#allocation54_spill] sm:$0xff] }
 0x653   : > { %2073 = vmatpush1.msra.mxu0 %v4046_v60  ;;  %2144 = vmatpush1.msra.mxu1 %v4189_v39  ;;  %v4885_v60 = vld [vmem:[#allocation38_spill] sm:$0xff] }
 0x654   : > { %2074 = vmatprep.subr.mxu0 %v4050_v61  ;;  %2145 = vmatprep.subr.mxu1 %v4193_v57  ;;  %v4886_v61 = vld [vmem:[#allocation44_spill] sm:$0xff] }
 0x655   : > { %2075 = vmatpush1.msra.mxu0 %v4054_v62  ;;  %2146 = vmatpush1.msra.mxu1 %v4197_v52  ;;  %v4887_v62 = vld [vmem:[#allocation28_spill] sm:$0xff] }
 0x656   : > { %2076 = vmatprep.subr.mxu0 %v4058_v63  ;;  %2147 = vmatprep.subr.mxu1 %v4201_v10  ;;  %v4888_v63 = vld [vmem:[#allocation45_spill] sm:$0xff] }
 0x657   : > { %2077 = vmatpush1.msra.mxu0 %v4062_v1  ;;  %2148 = vmatpush1.msra.mxu1 %v4205_v38  ;;  %v4889_v1 = vld [vmem:[#allocation39_spill] sm:$0xff] }
 0x658   : > { %2078 = vmatprep.subr.mxu0 %v4066_v2  ;;  %2149 = vmatprep.subr.mxu1 %v4209_v46  ;;  %v4890_v2 = vld [vmem:[#allocation34_spill] sm:$0xff]  ;;  %v4900_v38 = vld [vmem:[#allocation55_spill] sm:$0xff] }
 0x659   : > { %2079 = vmatpush1.msra.mxu0 %v4070_v3  ;;  %2150 = vmatpush1.msra.mxu1 %v4213_v47  ;;  %v4891_v3 = vld [vmem:[#allocation29_spill] sm:$0xff] }
 0x65a   : > { %2080 = vmatprep.subr.mxu0 %v4074_v4  ;;  %2151 = vmatprep.subr.mxu1 %v4217_v12  ;;  %v4892_v4 = vld [vmem:[#allocation24_spill] sm:$0xff] }
 0x65b   : > { %2081 = vmatpush1.msra.mxu0 %v4078_v5  ;;  %2152 = vmatpush1.msra.mxu1 %v4221_v15  ;;  %v4893_v5 = vld [vmem:[#allocation40_spill] sm:$0xff] }
 0x65c   : > { %2082 = vmatprep.subr.mxu0 %v4082_v6  ;;  %2153 = vmatprep.subr.mxu1 %v4225_v17  ;;  %v4894_v6 = vld [vmem:[#allocation35_spill] sm:$0xff] }
 0x65d   : > { %2083 = vmatpush1.msra.mxu0 %v4086_v7  ;;  %2154 = vmatpush1.msra.mxu1 %v4229_v22  ;;  %v4895_v7 = vmov 0.0  }
 0x65e   : > { %2084 = vmatprep.subr.mxu0 %v4090_v8  ;;  %2155 = vmatprep.subr.mxu1 %v4233_v24  ;;  %v4896_v8 = vld [vmem:[#allocation30_spill] sm:$0xff] }
 0x65f   : > { %2085 = vmatpush1.msra.mxu0 %v4094_v9  ;;  %2156 = vmatpush1.msra.mxu1 %v4237_v29  ;;  %v2257_v9 = vld [vmem:[#allocation7 + $0x78] sm:$0xff] }
 0x660   : > { %2086 = vmatprep.subr.mxu0 %v4098_v14  ;;  %2157 = vmatprep.subr.mxu1 %v4241_v31 }
 0x661   : > { %2087 = vmatpush1.msra.mxu0 %v4102_v18  ;;  %2158 = vmatpush1.msra.mxu1 %v4245_v43  ;;  %v4897_v18 = vld [vmem:[#allocation69_spill] sm:$0xff] }
 0x662   : > { %2088 = vmatprep.subr.mxu0 %v4106_v20  ;;  %2159 = vmatprep.subr.mxu1 %v4249_v54 }
 0x663   : > { %2089 = vmatpush1.msra.mxu0 %v4110_v21  ;;  %2160 = vmatpush1.msra.mxu1 %v4879_v55  ;;  %v2243_v55 = vld [vmem:[#allocation7 + $0x8] sm:$0xff] }
 0x664   : > { %2090 = vmatprep.subr.mxu0 %v4880_v48  ;;  %2161 = vmatprep.subr.mxu1 %v4881_v37  ;;  %v2242_v48 = vld [vmem:[#allocation7] sm:$0xff]  ;;  %v4902_v37 = vld [vmem:[#allocation21_spill] sm:$0xff] }
 0x665   : > { %2091 = vmatpush1.msra.mxu0 %v4882_v36  ;;  %2162 = vmatpush1.msra.mxu1 %v4883_v33  ;;  %v4903_v36 = vld [vmem:[#allocation23_spill] sm:$0xff]  ;;  %v4904_v33 = vld [vmem:[#allocation36_spill] sm:$0xff] }
 0x666   : > { %2092 = vmatprep.subr.mxu0 %v4884_v59  ;;  %2163 = vmatprep.subr.mxu1 %v4885_v60  ;;  %v4905_v59 = vld [vmem:[#allocation41_spill] sm:$0xff] }
 0x667   : > { %2093 = vmatpush1.msra.mxu0 %v4886_v61  ;;  %2164 = vmatpush1.msra.mxu1 %v4887_v62  ;;  %v4906_v61 = vld [vmem:[#allocation59_spill] sm:$0xff]  ;;  %v4907_v62 = vld [vmem:[#allocation20_spill] sm:$0xff] }
 0x668   : > { %2094 = vmatprep.subr.mxu0 %v4888_v63  ;;  %2165 = vmatprep.subr.mxu1 %v4889_v1  ;;  %v622_v63 = vadd.f32 %v4907_v62, %v4906_v61  ;;  %v4908_v1 = vld [vmem:[#allocation71_spill] sm:$0xff] }
 0x669   : > { %2095 = vmatpush1.msra.mxu0 %v4890_v2  ;;  %2166 = vmatpush1.msra.mxu1 %v4891_v3 }
 0x66a   : > { %2096 = vmatprep.subr.mxu0 %v4892_v4  ;;  %2167 = vmatprep.subr.mxu1 %v4893_v5 }
 0x66b   : > { %2097 = vmatpush1.msra.mxu0 %v4894_v6  ;;  %2130 = vmatprep.mubr.f32.mxu0 %v4895_v7 }
 0x66c   : > { %2168 = vmatpush1.msra.mxu1 %v4896_v8  ;;  %2201 = vmatprep.mubr.f32.mxu1 %v4895_v7  ;;  %v4909_v8 = vld [vmem:[#allocation56_spill] sm:$0xff] }
 0x66d   : > { %2697 = vmatprep.subr.mxu0 %v2257_v9 }
 0x70c   : > { %v1957_v14 = vpop.f32.mrf.mxu0  ;;  %v2028_v50 = vpop.f32.mrf.mxu1 }
 0x70d   : > { %v1958_v20 = vadd.f32 %v1957_v14, %v4897_v18  ;;  %v2029_v39 = vadd.f32 %v2028_v50, %v4899_v53 }
 0x70e   : > { %v1959_v21 = vpop.f32.mrf.mxu0  ;;  %v2030_v57 = vpop.f32.mrf.mxu1 }
 0x70f   : > { %v2655_v35 = vmul.f32 -1.442695, %v1958_v20  ;;  %v1960_v51 = vadd.f32 %v1959_v21, %v4898_v45  ;;  %v2657_v52 = vmul.f32 -1.442695, %v2029_v39  ;;  %v2031_v46 = vadd.f32 %v2030_v57, %v4900_v38  ;;  %v4910_v20 = vld [vmem:[#allocation57_spill] sm:$0xff] }
 0x711   : > { %2914 = vpow2.f32 %v2655_v35  ;;  %v2656_v58 = vmul.f32 -1.442695, %v1960_v51 }
 0x713   : > { %2916 = vpow2.f32 %v2656_v58  ;;  %v4472_v58 = vld [vmem:[%s4596_s7] ss:$0 sm:$0xff] }
 0x714   : > { %2918 = vpow2.f32 %v2657_v52 }
 0x71e   : > { %v2915_v10 = vpop.eup %2914 }
 0x71f   : > { %v2042_v47 = vadd.f32 1.0, %v2915_v10 }
 0x720   : > { %v2917_v12 = vpop.eup %2916 }
 0x721   : > { %2920 = vrcp.f32 %v2042_v47  ;;  %v2043_v15 = vadd.f32 1.0, %v2917_v12  ;;  %v2919_v17 = vpop.eup %2918 }
 0x722   : > { %2922 = vtanh.f32 %v2031_v46  ;;  %v2044_v31 = vadd.f32 1.0, %v2919_v17 }
 0x723   : > { %2924 = vrcp.f32 %v2043_v15 }
 0x724   : > { %2926 = vrcp.f32 %v2044_v31 }
 0x72e   : > { %v2921_v22 = vpop.eup %2920 }
 0x72f   : > { %v2923_v24 = vpop.eup %2922  ;;  %v2052_v43 = vmul.f32 %v2921_v22, %v4375_v28  ;;  %v2246_v28 = vld [vmem:[#allocation7 + $0x20] sm:$0xff] }
 0x730   : > { %v2925_v29 = vpop.eup %2924 }
 0x731   : > { %v2053_v54 = vmul.f32 %v2925_v29, %v2923_v24  ;;  %v2927_v41 = vpop.eup %2926 }
 0x733   : > { %v4451_v44 = vadd.f32 %v2053_v54, %v2052_v43 }
 0x735   : > { %2928 = vtanh.f32 %v4451_v44 }
 0x742   : > { %v2929_v30 = vpop.eup %2928 }
 0x743   : > { %v2056_v32 = vmul.f32 %v2929_v30, %v2927_v41 }
 0x745   : > { %2131 = vmatmul.mubr.f32.vlgmr.msra.gmra.mxu0 %v2056_v32  ;;  %2202 = vmatmul.mubr.f32.vlgmr.msra.gmra.mxu1 %v2056_v32 }
 0x746   : > { %2698 = vmatpush3.msra.mxu0 %v2257_v9  ;;  %2729 = vmatprep.mubr.f32.mxu0 %v4901_v16 }
 0x747   : > { %2699 = vmatprep.subr.mxu0 %v2256_v25 }
 0x748   : > { %2700 = vmatpush3.msra.mxu0 %v2256_v25 }
 0x749   : > { %2701 = vmatprep.subr.mxu0 %v2255_v56 }
 0x74a   : > { %2702 = vmatpush3.msra.mxu0 %v2255_v56 }
 0x74b   : > { %2703 = vmatprep.subr.mxu0 %v2254_v0 }
 0x74c   : > { %2704 = vmatpush3.msra.mxu0 %v2254_v0 }
 0x74d   : > { %2705 = vmatprep.subr.mxu0 %v2253_v34 }
 0x74e   : > { %2706 = vmatpush3.msra.mxu0 %v2253_v34 }
 0x74f   : > { %2707 = vmatprep.subr.mxu0 %v2252_v11 }
 0x750   : > { %2708 = vmatpush3.msra.mxu0 %v2252_v11 }
 0x751   : > { %2709 = vmatprep.subr.mxu0 %v2251_v49 }
 0x752   : > { %2710 = vmatpush3.msra.mxu0 %v2251_v49 }
 0x753   : > { %2711 = vmatprep.subr.mxu0 %v2250_v40 }
 0x754   : > { %2712 = vmatpush3.msra.mxu0 %v2250_v40 }
 0x755   : > { %2713 = vmatprep.subr.mxu0 %v2249_v19 }
 0x756   : > { %2714 = vmatpush3.msra.mxu0 %v2249_v19 }
 0x757   : > { %2715 = vmatprep.subr.mxu0 %v2248_v23 }
 0x758   : > { %2716 = vmatpush3.msra.mxu0 %v2248_v23 }
 0x759   : > { %2717 = vmatprep.subr.mxu0 %v2247_v42 }
 0x75a   : > { %2718 = vmatpush3.msra.mxu0 %v2247_v42 }
 0x75b   : > { %2719 = vmatprep.subr.mxu0 %v2246_v28 }
 0x75c   : > { %2720 = vmatpush3.msra.mxu0 %v2246_v28 }
 0x75d   : > { %2721 = vmatprep.subr.mxu0 %v2245_v27 }
 0x75e   : > { %2722 = vmatpush3.msra.mxu0 %v2245_v27 }
 0x75f   : > { %2723 = vmatprep.subr.mxu0 %v2244_v13 }
 0x760   : > { %2724 = vmatpush3.msra.mxu0 %v2244_v13 }
 0x761   : > { %2725 = vmatprep.subr.mxu0 %v2243_v55 }
 0x762   : > { %2726 = vmatpush3.msra.mxu0 %v2243_v55 }
 0x763   : > { %2727 = vmatprep.subr.mxu0 %v2242_v48 }
 0x764   : > { %2728 = vmatpush3.msra.mxu0 %v2242_v48 }
 0x765   : > { %2730 = vmatmul.mubr.f32.vlgmr.msra.gmra.mxu0 %v4902_v37 }
 0x766   : > { %2732 = vmatprep.mubr.f32.mxu0 %v4903_v36 }
 0x769   : > { %2733 = vmatmul.mubr.f32.gmra.mxu0 %v4904_v33 }
 0x76a   : > { %2735 = vmatprep.mubr.f32.mxu0 %v4905_v59 }
 0x76d   : > { %2736 = vmatmul.mubr.f32.gmra.mxu0 %v4378_v26 }
 0x76e   : > { %2738 = vmatprep.mubr.f32.mxu0 %v2056_v32 }
 0x805   : > { %v2132_v60 = vpop.f32.mrf.mxu0  ;;  %v2203_v7 = vpop.f32.mrf.mxu1 }
 0x806   : > { %v2133_v2 = vadd.f32 %v2132_v60, %v4908_v1  ;;  %v2204_v9 = vadd.f32 %v2203_v7, %v4909_v8 }
 0x807   : > { %v2134_v3 = vpop.f32.mrf.mxu0  ;;  %v2205_v14 = vpop.f32.mrf.mxu1 }
 0x808   : > { %v2658_v4 = vmul.f32 -1.442695, %v2133_v2  ;;  %v2135_v5 = vadd.f32 %v2134_v3, %v622_v63  ;;  %v2660_v18 = vmul.f32 -1.442695, %v2204_v9  ;;  %v2206_v21 = vadd.f32 %v2205_v14, %v4910_v20 }
 0x80a   : > { %2930 = vpow2.f32 %v2658_v4  ;;  %v2659_v6 = vmul.f32 -1.442695, %v2135_v5 }
 0x80c   : > { %2932 = vpow2.f32 %v2659_v6 }
 0x80d   : > { %2934 = vpow2.f32 %v2660_v18 }
 0x817   : > { %v2931_v26 = vpop.eup %2930 }
 0x818   : > { %v2217_v35 = vadd.f32 1.0, %v2931_v26 }
 0x819   : > { %v2933_v45 = vpop.eup %2932 }
 0x81a   : > { %2936 = vrcp.f32 %v2217_v35  ;;  %v2218_v51 = vadd.f32 1.0, %v2933_v45  ;;  %v2935_v53 = vpop.eup %2934 }
 0x81b   : > { %2938 = vtanh.f32 %v2206_v21  ;;  %v2219_v47 = vadd.f32 1.0, %v2935_v53 }
 0x81c   : > { %2940 = vrcp.f32 %v2218_v51 }
 0x81d   : > { %2942 = vrcp.f32 %v2219_v47 }
 0x825   : > { %v2731_v50 = vpop.f32.mrf.mxu0 }
 0x826   : > { %v2337_v39 = vadd.f32 %v2731_v50, %v4472_v58 }
 0x827   : > { %v2937_v57 = vpop.eup %2936  ;;  %v2331_v52 = vpop.f32.mrf.mxu0 }
 0x828   : > { %v2939_v10 = vpop.eup %2938  ;;  %2371 = vst [vmem:[%s4475_s22 + $0x8] sm:$0xff] %v2337_v39  ;;  %v2332_v38 = vadd.f32 %v4472_v58, %v2331_v52  ;;  %v2227_v15 = vmul.f32 %v2937_v57, %v4451_v44 }
 0x829   : > { %v2941_v46 = vpop.eup %2940  ;;  %v2734_v12 = vpop.f32.mrf.mxu0 }
 0x82a   : > { %v2228_v17 = vmul.f32 %v2941_v46, %v2939_v10  ;;  %2370 = vst [vmem:[%s4475_s22] sm:$0xff] %v2332_v38  ;;  %v2347_v22 = vadd.f32 %v2734_v12, %v4472_v58  ;;  %v2943_v30 = vpop.eup %2942 }
 0x82b   : > { %v2341_v24 = vpop.f32.mrf.mxu0 }
 0x82c   : > { %v2229_v29 = vadd.f32 %v2228_v17, %v2227_v15  ;;  %2373 = vst [vmem:[%s4475_s22 + $0x18] sm:$0xff] %v2347_v22  ;;  %v2342_v31 = vadd.f32 %v4472_v58, %v2341_v24 }
 0x82d   : > { %v2737_v43 = vpop.f32.mrf.mxu0 }
 0x82e   : > { %2372 = vst [vmem:[%s4475_s22 + $0x10] sm:$0xff] %v2342_v31  ;;  %v2357_v54 = vadd.f32 %v2737_v43, %v4472_v58  ;;  %2944 = vtanh.f32 %v2229_v29  ;;  %2379 = vst [vmem:[%s4487_s28] sm:$0xff] %v2229_v29 }
 0x82f   : > { %v2351_v44 = vpop.f32.mrf.mxu0 }
 0x830   : > { %2375 = vst [vmem:[%s4475_s22 + $0x28] sm:$0xff] %v2357_v54  ;;  %v2352_v41 = vadd.f32 %v4472_v58, %v2351_v44 }
 0x832   : > { %2374 = vst [vmem:[%s4475_s22 + $0x20] sm:$0xff] %v2352_v41 }
 0x83b   : > { %v2945_v32 = vpop.eup %2944 }
 0x83c   : > { %v2231_v25 = vmul.f32 %v2945_v32, %v2943_v30 }
 0x83e   : > { %2739 = vmatmul.mubr.f32.gmra.mxu0 %v2231_v25  ;;  %2378 = vst [vmem:[%s419_s30] sm:$0xff] %v2231_v25 }
 0x83f   : > { %3075 = shalt.err (!%p3072_p3)
}
 0x840   : > { %s3076_s21 = scalar_lea.hbm %s2418_s26, 128  ;;  %s3080_s12 = scalar_lea.hbm %s4598_s9, 256 }
 0x841   : > { %p3077_p2 = scmp.ne.s32.totalorder %s2418_s26, %s3076_s21  ;;  %p3081_p6 = scmp.lt.s32.totalorder %s2418_s26, %s4598_s9 }
 0x842   : > { %p3082_p9 = scmp.lt.s32.totalorder %s3080_s12, %s3076_s21 }
 0x843   : > { %p3078_p4 = pnand %p3077_p2, %p3295_p5 }
 0x844   : > { %p3083_p7 = por %p3082_p9, %p3081_p6 }
 0x845   : > { %p3079_p13 = pneg %p3078_p4 }
 0x847   : > { %p3084_p10 = pnand %p3083_p7, %p3079_p13 }
 0x849   : > { %3087 = shalt.err (!%p3084_p10)
}
 0x84a   : > { %2750 = dma.vmem_to_hbm [thread:$0]  (%p3295_p5), %s2421_s29, 128, %s2418_s26, %s4500_s11  }
 0x84b   : > { %s4911_s0 = sshll.u32 %s3276_s17, 7  ;;  %s2433_s30 = sshll.u32 %s4487_s28, 4  ;;  %s2434_s30 = int_to_ptr.vmem [resolvable:$true] %s2433_s30 }
 0x84c   : > { %s2431_s25 = scalar_lea.hbm %s4599_s10, %s4911_s0  ;;  %s3088_s2 = scalar_lea.vmem %s2434_s30, 128 }
 0x84d   : > { %p3089_p12 = scmp.ne.s32.totalorder %s2434_s30, %s3088_s2  ;;  %s3196_s20 = smov [#allocation12]  }
 0x84e   : > { %s3092_s21 = sshll.u32 %s3196_s20, 4  ;;  %s3093_s21 = int_to_ptr.vmem [resolvable:$false] %s3092_s21 }
 0x84f   : > { %p3090_p8 = pnand %p3089_p12, %p3295_p5  ;;  %s3094_s27 = scalar_lea.vmem %s3093_s21, 256 }
 0x850   : > { %p3095_p0 = scmp.lt.s32.totalorder %s2434_s30, %s3093_s21  ;;  %p3096_p1 = scmp.lt.s32.totalorder %s3094_s27, %s3088_s2 }
 0x851   : > { %p3091_p11 = pneg %p3090_p8 }
 0x852   : > { %p3097_p3 = por %p3096_p1, %p3095_p0 }
 0x854   : > { %p3098_p2 = pnand %p3097_p3, %p3091_p11 }
 0x856   : > { %3101 = shalt.err (!%p3098_p2)
}
 0x857   : > { %s3102_s26 = scalar_lea.hbm %s2431_s25, 128  ;;  %s3106_s12 = scalar_lea.hbm %s4599_s10, 256 }
 0x858   : > { %p3103_p4 = scmp.ne.s32.totalorder %s2431_s25, %s3102_s26  ;;  %p3107_p9 = scmp.lt.s32.totalorder %s2431_s25, %s4599_s10 }
 0x859   : > { %p3108_p7 = scmp.lt.s32.totalorder %s3106_s12, %s3102_s26 }
 0x85a   : > { %p3104_p13 = pnand %p3103_p4, %p3295_p5 }
 0x85b   : > { %p3109_p10 = por %p3108_p7, %p3107_p9 }
 0x85c   : > { %p3105_p6 = pneg %p3104_p13 }
 0x85e   : > { %p3110_p12 = pnand %p3109_p10, %p3105_p6 }
 0x860   : > { %3113 = shalt.err (!%p3110_p12)
}
 0x861   : > { %2751 = dma.vmem_to_hbm [thread:$0]  (%p3295_p5), %s2434_s30, 128, %s2431_s25, %s4500_s11  }
 0x862   : > { %s2404_s18 = sshll.u32 %s4475_s22, 4  ;;  %s2672_s2 = sshll.u32 %s3276_s17, 10  ;;  %s4537_s18 = int_to_ptr.vmem [resolvable:$true] %s2404_s18 }
 0x863   : > { %s4542_s27 = scalar_lea.hbm %s4597_s8, %s2672_s2  ;;  %s2381_s11 = scalar_lea.sflag [#allocation6], %s4466_s15 }
 0x864   : > { %s3114_s17 = scalar_lea.vmem %s4537_s18, 1024  ;;  %s3197_s25 = smov [#allocation9]  }
 0x865   : > { %p3115_p8 = scmp.ne.s32.totalorder %s4537_s18, %s3114_s17  ;;  %s3118_s30 = sshll.u32 %s3197_s25, 4  ;;  %s3119_s30 = int_to_ptr.vmem [resolvable:$false] %s3118_s30 }
 0x866   : > { %s3120_s26 = scalar_lea.vmem %s3119_s30, 2048  ;;  %p3121_p1 = scmp.lt.s32.totalorder %s4537_s18, %s3119_s30 }
 0x867   : > { %p3116_p11 = pnand %p3115_p8, %p3295_p5  ;;  %p3122_p3 = scmp.lt.s32.totalorder %s3120_s26, %s3114_s17 }
 0x869   : > { %p3117_p0 = pneg %p3116_p11  ;;  %p3123_p2 = por %p3122_p3, %p3121_p1 }
 0x86b   : > { %p3124_p4 = pnand %p3123_p2, %p3117_p0 }
 0x8fe   : > { %v2740_v16 = vpop.f32.mrf.mxu0 }
 0x8ff   : > { %v2367_v56 = vadd.f32 %v2740_v16, %v4472_v58 }
 0x900   : > { %v2361_v0 = vpop.f32.mrf.mxu0 }
 0x901   : > { %2377 = vst [vmem:[%s4475_s22 + $0x38] sm:$0xff] %v2367_v56  ;;  %v2362_v34 = vadd.f32 %v4472_v58, %v2361_v0 }
 0x903   : > { %2376 = vst [vmem:[%s4475_s22 + $0x30] sm:$0xff] %v2362_v34 }
 0x904   : > { %3127 = shalt.err (!%p3124_p4)
}
 0x905   : > { %s3128_s22 = scalar_lea.hbm %s4542_s27, 1024  ;;  %s3132_s12 = scalar_lea.hbm %s4597_s8, 2048 }
 0x906   : > { %p3129_p13 = scmp.ne.s32.totalorder %s4542_s27, %s3128_s22  ;;  %p3133_p7 = scmp.lt.s32.totalorder %s4542_s27, %s4597_s8 }
 0x907   : > { %p3134_p10 = scmp.lt.s32.totalorder %s3132_s12, %s3128_s22 }
 0x908   : > { %p3130_p6 = pnand %p3129_p13, %p3295_p5 }
 0x909   : > { %p3135_p12 = por %p3134_p10, %p3133_p7 }
 0x90a   : > { %p3131_p9 = pneg %p3130_p6 }
 0x90c   : > { %p3136_p8 = pnand %p3135_p12, %p3131_p9 }
 0x90e   : > { %3139 = shalt.err (!%p3136_p8)
}
 0x90f   : > { %s3198_s2 = smov 128   ;;  %s3199_s20 = smov 8  }
 0x910   : > { %2749 = dma.vmem_to_hbm [thread:$0]  (%p3295_p5), %s4537_s18, 1024, %s4542_s27, %s2381_s11, %s3198_s2, %s3198_s2, %s3199_s20  }
 0x911 PF: > { %p2776_p11 = scmp.ge.s32.totalorder %s3186_s16, 2  ;;  %s2445_s21 = sand.u32 1, %s3174_s13  }
 0x912   : > { %p4912_p0 = scmp.ne.s32.totalorder %s4706_s24, 0  ;;  %s2446_s17 = scalar_lea.sflag [#allocation6], %s2445_s21 }
 0x914   : > { %p2763_p1 = pnand %p2776_p11, %p4912_p0 }
 0x916   : > { %p2764_p3 = pneg %p2763_p1 }
 0x918   : > { %3165 = dma.done.wait (%p2764_p3), %s2446_s17, 1024  }
 0x919   : > { %3167 = vsyncadd (%p2764_p3), %s2446_s17, 4294966272  ;;  %s4913_s25 = sadd.s32 4294967294, %s3186_s16  }
 0x91a   : > { %s2454_s30 = sand.u32 1, %s4913_s25  }
 0x91b   : > { %s2455_s26 = scalar_lea.sflag [#allocation11], %s2454_s30 }
 0x91c   : > { %3169 = dma.done.wait (%p2764_p3), %s2455_s26, 256  }
 0x91d   : > { %3171 = vsyncadd (%p2764_p3), %s2455_s26, 4294967040  ;;  %s4914_s23 = sld [smem:[#allocation17_spill]]  ;;  %p26_p5 = scmp.ge.s32.totalorder %s3280_s19, 4  }
 0x91e   : > { %s4915_s15 = sld [smem:[#allocation18_spill]]  ;;  %s4916_s13 = smov %s3178_s14 }
 0x91f   : > { %s4918_s16 = smov %s3280_s19  ;;  %28 = sbr.rel (!%p26_p5) target bundleno = 11 (0xb), region = 149 }
 0x923   : > { %s4917_s14 = smov %s4914_s23 }
 0x924   :  { %2469 = vsyncpa [#allocation5], 1 }
 0x925   :  { %2471 = vsyncpa [#allocation5 + $0x1], 1 }
 0x926   :  { %2472 = vsyncpa [#allocation8], 1 }
 0x927   :  { %2473 = vsyncpa [#allocation6], 1 }
 0x928   :  { %2475 = vsyncpa [#allocation6 + $0x1], 1 }
 0x929   :  { %2476 = vsyncpa [#allocation11], 1 }
 0x92a   :  { %2478 = vsyncpa [#allocation11 + $0x1], 1 }

</bundles_post_ra>
